<compile_context>
chip_gen: v7x
topology: tpu7x:2x2x1
jax: 0.10.0
libtpu: 0.0.40
codegen_flags: <defaults>
</compile_context>

<pallas_src>
import functools

import jax
import jax.numpy as jnp
from jax.experimental import pallas as pl
from jax.experimental.pallas import tpu as pltpu

EPS = 1e-5  # nn.BatchNorm2d default eps


def _five_normal_conv_kernel(x_ref, w_ref, mask_ref, gamma_ref, beta_ref,
                             o_ref, *, W, mxu_dtype):
    """Whole (small) problem in VMEM; single invocation.

    x_ref     : (Cin, M)        activations, M = N*H*W (flat, lane axis)
    w_ref     : (9, Cout, Cin)  conv weight, one (Cout, Cin) matrix per tap
    mask_ref  : (9, M)          {0,1} mask killing taps that cross a row/image edge
    gamma_ref : (Cout, 1)       BN weight
    beta_ref  : (Cout, 1)       BN bias
    o_ref     : (Cout, M)       output (lane-dense writeback)
    """
    Cin, M = x_ref.shape

    # Loop-invariant loads, hoisted above the 3x unrolled layer loop
    # (weights / gamma / beta only — the mask is deliberately NOT hoisted).
    w_taps = [w_ref[t].astype(mxu_dtype) for t in range(9)]   # 9 x (Cout, Cin)
    gamma = gamma_ref[...]                                    # (Cout, 1)
    beta = beta_ref[...]                                      # (Cout, 1)
    inv_m = 1.0 / M

    x = x_ref[...]                                            # (Cin, M) f32

    taps = [(dh, dw) for dh in (-1, 0, 1) for dw in (-1, 0, 1)]

    for _layer in range(3):  # conv3x3 -> BN(train stats) -> ReLU, same params x3
        # ---- 3x3 conv as 9 accumulated MXU matmuls (no im2col scratch) ------
        acc = None
        for t, (dh, dw) in enumerate(taps):
            delta = dh * W + dw            # static flat-index shift for this tap
            if delta == 0:
                x_t = x                    # center tap: no shift, mask is all-ones
            else:
                # Lane-aligned full-width rotate (XLU); the {0,1} mask zeroes
                # every wrapped / out-of-image column, so wraparound is harmless.
                x_t = pltpu.roll(x, (-delta) % M, 1)
                x_t = x_t * mask_ref[t:t + 1, :]   # per-tap slice, fused mask
            part = jnp.dot(w_taps[t], x_t.astype(mxu_dtype),
                           preferred_element_type=jnp.float32)   # (Cout, M) f32
            acc = part if acc is None else acc + part
        # conv bias intentionally omitted: a per-channel constant is exactly
        # cancelled by the train-mode BN mean subtraction below.

        # ---- BatchNorm2d training mode: single-pass (biased) batch stats -----
        mean = jnp.sum(acc, axis=1, keepdims=True) * inv_m           # (Cout, 1)
        ex2 = jnp.sum(acc * acc, axis=1, keepdims=True) * inv_m
        var = jnp.maximum(ex2 - mean * mean, 0.0)
        scale = gamma * jax.lax.rsqrt(var + EPS)                      # EUP rsqrt
        shift = beta - mean * scale
        # TODO(synk): running_mean/running_var updates of nn.BatchNorm2d are a
        # training-only side effect that never touches the returned tensor;
        # they are not reproduced here.

        # ---- folded affine + ReLU: one FMA pass over the tile ----------------
        x = jnp.maximum(acc * scale + shift, 0.0)

    o_ref[...] = x


def _build_tap_mask(N, H, W):
    """(9, N*H*W) {0,1} float mask: 0 where tap (dh, dw) leaves the image."""
    M = N * H * W
    idx = jnp.arange(M, dtype=jnp.int32)
    h = (idx // W) % H
    w = idx % W
    rows = []
    for dh in (-1, 0, 1):
        for dw in (-1, 0, 1):
            valid = ((h + dh >= 0) & (h + dh < H) &
                     (w + dw >= 0) & (w + dw < W)).astype(jnp.float32)
            rows.append(valid)
    return jnp.stack(rows, axis=0)


def five_normal_conv(x_nchw, weight_hwio, bias, gamma, beta,
                     *, mxu_dtype=jnp.float32):
    """JAX wrapper matching the PyTorch module's forward (NCHW in / NCHW out).

    weight_hwio = torch_conv_weight.permute(2, 3, 1, 0)  (kh, kw, Cin, Cout)
    `bias` is accepted for signature parity but unused: train-mode BN mean
    subtraction cancels a per-channel constant exactly.
    `mxu_dtype=jnp.bfloat16` feeds the MXU at its native rate on v5e/v6e/v7x
    (accumulation stays f32); default f32 matches the torch f32 forward exactly.
    """
    N, C, H, W = x_nchw.shape
    KH, KW, Cin, Cout = weight_hwio.shape
    assert (KH, KW) == (3, 3) and Cin == C and Cout == C, \
        "five_normal_conv requires ch_in == ch_out (conv is re-applied to its own output)"
    del bias
    M = N * H * W

    # Lane-dense layouts at the kernel boundary.
    x2d = jnp.transpose(x_nchw, (1, 0, 2, 3)).reshape(C, M).astype(jnp.float32)
    # (9, Cout, Cin): tap t = (dh+1)*3 + (dw+1), matching the in-kernel loop order.
    w_taps = jnp.transpose(weight_hwio, (0, 1, 3, 2)).reshape(9, Cout, Cin)
    w_taps = w_taps.astype(jnp.float32)
    g2 = gamma.reshape(Cout, 1).astype(jnp.float32)
    b2 = beta.reshape(Cout, 1).astype(jnp.float32)
    mask9 = _build_tap_mask(N, H, W)                            # (9, M) only

    # Whole problem fits comfortably in VMEM at these shapes, so a single
    # grid-less invocation is optimal.
    # TODO(synk): for realistic sizes, tile M with a BlockSpec grid (halo rows
    # between layers + accumulate-then-finalize BN stats on an "arbitrary"
    # axis, "parallel" axis for v7x's two TensorCores), size tiles against
    # 16/32 MiB scoped VMEM (v5e/v7x defaults) and set
    # pltpu.CompilerParams(vmem_limit_bytes=...) explicitly.
    vmem = pl.BlockSpec(memory_space=pltpu.MemorySpace.VMEM)
    out2d = pl.pallas_call(
        functools.partial(_five_normal_conv_kernel, W=W, mxu_dtype=mxu_dtype),
        out_shape=jax.ShapeDtypeStruct((Cout, M), jnp.float32),
        in_specs=[vmem, vmem, vmem, vmem, vmem],
        out_specs=vmem,
        cost_estimate=pl.CostEstimate(
            flops=3 * 2 * 9 * Cin * Cout * M,
            transcendentals=3 * Cout,
            bytes_accessed=4 * (Cin * M + Cout * M + 9 * M
                                + 9 * Cin * Cout + 2 * Cout),
        ),
    )(x2d, w_taps, mask9, g2, b2)

    return jnp.transpose(out2d.reshape(Cout, N, H, W), (1, 0, 2, 3))


def _reference(x_nchw, weight_hwio, bias, gamma, beta, conv_dtype=jnp.float32):
    """Pure-JAX reference of the torch forward (training-mode BN, with bias).

    `conv_dtype` lets the reference quantize the conv operands the same way the
    kernel's MXU path does (bf16 operands, f32 accumulation)."""
    w_oihw = jnp.transpose(weight_hwio, (3, 2, 0, 1))
    x = x_nchw.astype(jnp.float32)
    for _ in range(3):
        y = jax.lax.conv_general_dilated(
            x.astype(conv_dtype), w_oihw.astype(conv_dtype),
            window_strides=(1, 1), padding=((1, 1), (1, 1)),
            dimension_numbers=("NCHW", "OIHW", "NCHW"),
            preferred_element_type=jnp.float32)
        y = y + bias.reshape(1, -1, 1, 1)
        mean = jnp.mean(y, axis=(0, 2, 3), keepdims=True)
        var = jnp.mean((y - mean) ** 2, axis=(0, 2, 3), keepdims=True)
        y = (y - mean) / jnp.sqrt(var + EPS)
        y = y * gamma.reshape(1, -1, 1, 1) + beta.reshape(1, -1, 1, 1)
        x = jnp.maximum(y, 0.0)
    return x


if __name__ == "__main__":
    key = jax.random.PRNGKey(0)
    k_x, k_w, k_b = jax.random.split(key, 3)

    # Small shapes consistent with the module: ch_in == ch_out == 4.
    N, C, H, W = 2, 4, 16, 16
    ch_in = ch_out = C

    x = jax.random.normal(k_x, (N, C, H, W), jnp.float32)

    # Deterministic parameter init (Conv2d-style uniform bound; BN defaults).
    fan_in = ch_in * 3 * 3
    bound = 1.0 / (fan_in ** 0.5)
    weight_hwio = jax.random.uniform(k_w, (3, 3, ch_in, ch_out), jnp.float32,
                                     minval=-bound, maxval=bound)
    conv_bias = jax.random.uniform(k_b, (ch_out,), jnp.float32,
                                   minval=-bound, maxval=bound)
    bn_gamma = jnp.ones((ch_out,), jnp.float32)   # nn.BatchNorm2d default weight
    bn_beta = jnp.zeros((ch_out,), jnp.float32)   # nn.BatchNorm2d default bias

    # f32 MXU operands: faithful to the torch module's f32 forward.
    out = jax.block_until_ready(
        five_normal_conv(x, weight_hwio, conv_bias, bn_gamma, bn_beta))
    ref = _reference(x, weight_hwio, conv_bias, bn_gamma, bn_beta)
    assert out.shape == (N, C, H, W)
    max_err = float(jnp.max(jnp.abs(out - ref)))
    assert jnp.allclose(out, ref, atol=1e-3, rtol=1e-3), f"f32 max_err={max_err}"

    # bf16 MXU operands (native MXU rate on v5e/v6e/v7x), checked against a
    # reference that quantizes the conv operands identically, so the tolerance
    # only absorbs accumulation-order / boundary re-rounding noise.
    out_bf16 = jax.block_until_ready(
        five_normal_conv(x, weight_hwio, conv_bias, bn_gamma, bn_beta,
                         mxu_dtype=jnp.bfloat16))
    ref_bf16 = _reference(x, weight_hwio, conv_bias, bn_gamma, bn_beta,
                          conv_dtype=jnp.bfloat16)
    max_err_bf16 = float(jnp.max(jnp.abs(out_bf16 - ref_bf16)))
    assert jnp.allclose(out_bf16, ref_bf16, atol=2e-2, rtol=2e-2), \
        f"bf16 max_err={max_err_bf16}"

    print("KERNEL_OK")
</pallas_src>

<mosaic_0001>
module attributes {stable_mosaic.version = 11 : i64} {
  func.func @_five_normal_conv_kernel(%arg0: memref<4x512xf32, #tpu.memory_space<vmem>>, %arg1: memref<9x4x4xf32, #tpu.memory_space<vmem>>, %arg2: memref<9x512xf32, #tpu.memory_space<vmem>>, %arg3: memref<4x1xf32, #tpu.memory_space<vmem>>, %arg4: memref<4x1xf32, #tpu.memory_space<vmem>>, %arg5: memref<4x512xf32, #tpu.memory_space<vmem>>) attributes {dimension_semantics = [], scalar_prefetch = 0 : i64, scratch_operands = 0 : i64, tpu.core_type = #tpu.core_type<tc>} {
    %c0 = arith.constant 0 : index
    %c0_0 = arith.constant 0 : index
    %c0_1 = arith.constant 0 : index
    %0 = vector.load %arg1[%c0, %c0_0, %c0_1] : memref<9x4x4xf32, #tpu.memory_space<vmem>>, vector<1x4x4xf32>
    %1 = vector.shape_cast %0 : vector<1x4x4xf32> to vector<4x4xf32>
    %c1 = arith.constant 1 : index
    %c0_2 = arith.constant 0 : index
    %c0_3 = arith.constant 0 : index
    %2 = vector.load %arg1[%c1, %c0_2, %c0_3] : memref<9x4x4xf32, #tpu.memory_space<vmem>>, vector<1x4x4xf32>
    %3 = vector.shape_cast %2 : vector<1x4x4xf32> to vector<4x4xf32>
    %c2 = arith.constant 2 : index
    %c0_4 = arith.constant 0 : index
    %c0_5 = arith.constant 0 : index
    %4 = vector.load %arg1[%c2, %c0_4, %c0_5] : memref<9x4x4xf32, #tpu.memory_space<vmem>>, vector<1x4x4xf32>
    %5 = vector.shape_cast %4 : vector<1x4x4xf32> to vector<4x4xf32>
    %c3 = arith.constant 3 : index
    %c0_6 = arith.constant 0 : index
    %c0_7 = arith.constant 0 : index
    %6 = vector.load %arg1[%c3, %c0_6, %c0_7] : memref<9x4x4xf32, #tpu.memory_space<vmem>>, vector<1x4x4xf32>
    %7 = vector.shape_cast %6 : vector<1x4x4xf32> to vector<4x4xf32>
    %c4 = arith.constant 4 : index
    %c0_8 = arith.constant 0 : index
    %c0_9 = arith.constant 0 : index
    %8 = vector.load %arg1[%c4, %c0_8, %c0_9] : memref<9x4x4xf32, #tpu.memory_space<vmem>>, vector<1x4x4xf32>
    %9 = vector.shape_cast %8 : vector<1x4x4xf32> to vector<4x4xf32>
    %c5 = arith.constant 5 : index
    %c0_10 = arith.constant 0 : index
    %c0_11 = arith.constant 0 : index
    %10 = vector.load %arg1[%c5, %c0_10, %c0_11] : memref<9x4x4xf32, #tpu.memory_space<vmem>>, vector<1x4x4xf32>
    %11 = vector.shape_cast %10 : vector<1x4x4xf32> to vector<4x4xf32>
    %c6 = arith.constant 6 : index
    %c0_12 = arith.constant 0 : index
    %c0_13 = arith.constant 0 : index
    %12 = vector.load %arg1[%c6, %c0_12, %c0_13] : memref<9x4x4xf32, #tpu.memory_space<vmem>>, vector<1x4x4xf32>
    %13 = vector.shape_cast %12 : vector<1x4x4xf32> to vector<4x4xf32>
    %c7 = arith.constant 7 : index
    %c0_14 = arith.constant 0 : index
    %c0_15 = arith.constant 0 : index
    %14 = vector.load %arg1[%c7, %c0_14, %c0_15] : memref<9x4x4xf32, #tpu.memory_space<vmem>>, vector<1x4x4xf32>
    %15 = vector.shape_cast %14 : vector<1x4x4xf32> to vector<4x4xf32>
    %c8 = arith.constant 8 : index
    %c0_16 = arith.constant 0 : index
    %c0_17 = arith.constant 0 : index
    %16 = vector.load %arg1[%c8, %c0_16, %c0_17] : memref<9x4x4xf32, #tpu.memory_space<vmem>>, vector<1x4x4xf32>
    %17 = vector.shape_cast %16 : vector<1x4x4xf32> to vector<4x4xf32>
    %c0_18 = arith.constant 0 : index
    %c0_19 = arith.constant 0 : index
    %18 = vector.load %arg3[%c0_18, %c0_19] : memref<4x1xf32, #tpu.memory_space<vmem>>, vector<4x1xf32>
    %c0_20 = arith.constant 0 : index
    %c0_21 = arith.constant 0 : index
    %19 = vector.load %arg4[%c0_20, %c0_21] : memref<4x1xf32, #tpu.memory_space<vmem>>, vector<4x1xf32>
    %c0_22 = arith.constant 0 : index
    %c0_23 = arith.constant 0 : index
    %20 = vector.load %arg0[%c0_22, %c0_23] : memref<4x512xf32, #tpu.memory_space<vmem>>, vector<4x512xf32>
    %c17_i32 = arith.constant 17 : i32
    %21 = tpu.dynamic_rotate %20 by %c17_i32 dim 1 : vector<4x512xf32>, i32 -> vector<4x512xf32>
    %c0_24 = arith.constant 0 : index
    %c0_25 = arith.constant 0 : index
    %22 = vector.load %arg2[%c0_24, %c0_25] : memref<9x512xf32, #tpu.memory_space<vmem>>, vector<1x512xf32>
    %23 = vector.broadcast %22 : vector<1x512xf32> to vector<4x512xf32>
    %24 = arith.mulf %21, %23 : vector<4x512xf32>
    %cst = arith.constant dense<0.000000e+00> : vector<4x512xf32>
    %25 = tpu.matmul %1, %24, %cst {dimension_numbers = #tpu.dot_dimension_numbers<[1], [0], [0], [1], [0, 0, 1, 1], [], []>} : vector<4x4xf32>, vector<4x512xf32>, vector<4x512xf32> -> vector<4x512xf32>
    %c16_i32 = arith.constant 16 : i32
    %26 = tpu.dynamic_rotate %20 by %c16_i32 dim 1 : vector<4x512xf32>, i32 -> vector<4x512xf32>
    %c1_26 = arith.constant 1 : index
    %c0_27 = arith.constant 0 : index
    %27 = vector.load %arg2[%c1_26, %c0_27] : memref<9x512xf32, #tpu.memory_space<vmem>>, vector<1x512xf32>
    %28 = vector.broadcast %27 : vector<1x512xf32> to vector<4x512xf32>
    %29 = arith.mulf %26, %28 : vector<4x512xf32>
    %cst_28 = arith.constant dense<0.000000e+00> : vector<4x512xf32>
    %30 = tpu.matmul %3, %29, %cst_28 {dimension_numbers = #tpu.dot_dimension_numbers<[1], [0], [0], [1], [0, 0, 1, 1], [], []>} : vector<4x4xf32>, vector<4x512xf32>, vector<4x512xf32> -> vector<4x512xf32>
    %31 = arith.addf %25, %30 : vector<4x512xf32>
    %c15_i32 = arith.constant 15 : i32
    %32 = tpu.dynamic_rotate %20 by %c15_i32 dim 1 : vector<4x512xf32>, i32 -> vector<4x512xf32>
    %c2_29 = arith.constant 2 : index
    %c0_30 = arith.constant 0 : index
    %33 = vector.load %arg2[%c2_29, %c0_30] : memref<9x512xf32, #tpu.memory_space<vmem>>, vector<1x512xf32>
    %34 = vector.broadcast %33 : vector<1x512xf32> to vector<4x512xf32>
    %35 = arith.mulf %32, %34 : vector<4x512xf32>
    %cst_31 = arith.constant dense<0.000000e+00> : vector<4x512xf32>
    %36 = tpu.matmul %5, %35, %cst_31 {dimension_numbers = #tpu.dot_dimension_numbers<[1], [0], [0], [1], [0, 0, 1, 1], [], []>} : vector<4x4xf32>, vector<4x512xf32>, vector<4x512xf32> -> vector<4x512xf32>
    %37 = arith.addf %31, %36 : vector<4x512xf32>
    %c1_i32 = arith.constant 1 : i32
    %38 = tpu.dynamic_rotate %20 by %c1_i32 dim 1 : vector<4x512xf32>, i32 -> vector<4x512xf32>
    %c3_32 = arith.constant 3 : index
    %c0_33 = arith.constant 0 : index
    %39 = vector.load %arg2[%c3_32, %c0_33] : memref<9x512xf32, #tpu.memory_space<vmem>>, vector<1x512xf32>
    %40 = vector.broadcast %39 : vector<1x512xf32> to vector<4x512xf32>
    %41 = arith.mulf %38, %40 : vector<4x512xf32>
    %cst_34 = arith.constant dense<0.000000e+00> : vector<4x512xf32>
    %42 = tpu.matmul %7, %41, %cst_34 {dimension_numbers = #tpu.dot_dimension_numbers<[1], [0], [0], [1], [0, 0, 1, 1], [], []>} : vector<4x4xf32>, vector<4x512xf32>, vector<4x512xf32> -> vector<4x512xf32>
    %43 = arith.addf %37, %42 : vector<4x512xf32>
    %cst_35 = arith.constant dense<0.000000e+00> : vector<4x512xf32>
    %44 = tpu.matmul %9, %20, %cst_35 {dimension_numbers = #tpu.dot_dimension_numbers<[1], [0], [0], [1], [0, 0, 1, 1], [], []>} : vector<4x4xf32>, vector<4x512xf32>, vector<4x512xf32> -> vector<4x512xf32>
    %45 = arith.addf %43, %44 : vector<4x512xf32>
    %c511_i32 = arith.constant 511 : i32
    %46 = tpu.dynamic_rotate %20 by %c511_i32 dim 1 : vector<4x512xf32>, i32 -> vector<4x512xf32>
    %c5_36 = arith.constant 5 : index
    %c0_37 = arith.constant 0 : index
    %47 = vector.load %arg2[%c5_36, %c0_37] : memref<9x512xf32, #tpu.memory_space<vmem>>, vector<1x512xf32>
    %48 = vector.broadcast %47 : vector<1x512xf32> to vector<4x512xf32>
    %49 = arith.mulf %46, %48 : vector<4x512xf32>
    %cst_38 = arith.constant dense<0.000000e+00> : vector<4x512xf32>
    %50 = tpu.matmul %11, %49, %cst_38 {dimension_numbers = #tpu.dot_dimension_numbers<[1], [0], [0], [1], [0, 0, 1, 1], [], []>} : vector<4x4xf32>, vector<4x512xf32>, vector<4x512xf32> -> vector<4x512xf32>
    %51 = arith.addf %45, %50 : vector<4x512xf32>
    %c497_i32 = arith.constant 497 : i32
    %52 = tpu.dynamic_rotate %20 by %c497_i32 dim 1 : vector<4x512xf32>, i32 -> vector<4x512xf32>
    %c6_39 = arith.constant 6 : index
    %c0_40 = arith.constant 0 : index
    %53 = vector.load %arg2[%c6_39, %c0_40] : memref<9x512xf32, #tpu.memory_space<vmem>>, vector<1x512xf32>
    %54 = vector.broadcast %53 : vector<1x512xf32> to vector<4x512xf32>
    %55 = arith.mulf %52, %54 : vector<4x512xf32>
    %cst_41 = arith.constant dense<0.000000e+00> : vector<4x512xf32>
    %56 = tpu.matmul %13, %55, %cst_41 {dimension_numbers = #tpu.dot_dimension_numbers<[1], [0], [0], [1], [0, 0, 1, 1], [], []>} : vector<4x4xf32>, vector<4x512xf32>, vector<4x512xf32> -> vector<4x512xf32>
    %57 = arith.addf %51, %56 : vector<4x512xf32>
    %c496_i32 = arith.constant 496 : i32
    %58 = tpu.dynamic_rotate %20 by %c496_i32 dim 1 : vector<4x512xf32>, i32 -> vector<4x512xf32>
    %c7_42 = arith.constant 7 : index
    %c0_43 = arith.constant 0 : index
    %59 = vector.load %arg2[%c7_42, %c0_43] : memref<9x512xf32, #tpu.memory_space<vmem>>, vector<1x512xf32>
    %60 = vector.broadcast %59 : vector<1x512xf32> to vector<4x512xf32>
    %61 = arith.mulf %58, %60 : vector<4x512xf32>
    %cst_44 = arith.constant dense<0.000000e+00> : vector<4x512xf32>
    %62 = tpu.matmul %15, %61, %cst_44 {dimension_numbers = #tpu.dot_dimension_numbers<[1], [0], [0], [1], [0, 0, 1, 1], [], []>} : vector<4x4xf32>, vector<4x512xf32>, vector<4x512xf32> -> vector<4x512xf32>
    %63 = arith.addf %57, %62 : vector<4x512xf32>
    %c495_i32 = arith.constant 495 : i32
    %64 = tpu.dynamic_rotate %20 by %c495_i32 dim 1 : vector<4x512xf32>, i32 -> vector<4x512xf32>
    %c8_45 = arith.constant 8 : index
    %c0_46 = arith.constant 0 : index
    %65 = vector.load %arg2[%c8_45, %c0_46] : memref<9x512xf32, #tpu.memory_space<vmem>>, vector<1x512xf32>
    %66 = vector.broadcast %65 : vector<1x512xf32> to vector<4x512xf32>
    %67 = arith.mulf %64, %66 : vector<4x512xf32>
    %cst_47 = arith.constant dense<0.000000e+00> : vector<4x512xf32>
    %68 = tpu.matmul %17, %67, %cst_47 {dimension_numbers = #tpu.dot_dimension_numbers<[1], [0], [0], [1], [0, 0, 1, 1], [], []>} : vector<4x4xf32>, vector<4x512xf32>, vector<4x512xf32> -> vector<4x512xf32>
    %69 = arith.addf %63, %68 : vector<4x512xf32>
    %cst_48 = arith.constant dense<0.000000e+00> : vector<4xf32>
    %70 = vector.multi_reduction <add>, %69, %cst_48 [1] : vector<4x512xf32> to vector<4xf32>
    %71 = vector.shape_cast %70 : vector<4xf32> to vector<4x1xf32>
    %cst_49 = arith.constant 0.001953125 : f32
    %72 = vector.broadcast %cst_49 : f32 to vector<4x1xf32>
    %73 = arith.mulf %71, %72 : vector<4x1xf32>
    %74 = arith.mulf %69, %69 : vector<4x512xf32>
    %cst_50 = arith.constant dense<0.000000e+00> : vector<4xf32>
    %75 = vector.multi_reduction <add>, %74, %cst_50 [1] : vector<4x512xf32> to vector<4xf32>
    %76 = vector.shape_cast %75 : vector<4xf32> to vector<4x1xf32>
    %cst_51 = arith.constant 0.001953125 : f32
    %77 = vector.broadcast %cst_51 : f32 to vector<4x1xf32>
    %78 = arith.mulf %76, %77 : vector<4x1xf32>
    %79 = arith.mulf %73, %73 : vector<4x1xf32>
    %80 = arith.subf %78, %79 : vector<4x1xf32>
    %cst_52 = arith.constant 0.000000e+00 : f32
    %81 = vector.broadcast %cst_52 : f32 to vector<4x1xf32>
    %82 = arith.maximumf %80, %81 : vector<4x1xf32>
    %cst_53 = arith.constant 9.99999974E-6 : f32
    %83 = vector.broadcast %cst_53 : f32 to vector<4x1xf32>
    %84 = arith.addf %82, %83 : vector<4x1xf32>
    %85 = math.rsqrt %84 : vector<4x1xf32>
    %86 = arith.mulf %18, %85 : vector<4x1xf32>
    %87 = arith.mulf %73, %86 : vector<4x1xf32>
    %88 = arith.subf %19, %87 : vector<4x1xf32>
    %89 = vector.broadcast %86 : vector<4x1xf32> to vector<4x512xf32>
    %90 = arith.mulf %69, %89 : vector<4x512xf32>
    %91 = vector.broadcast %88 : vector<4x1xf32> to vector<4x512xf32>
    %92 = arith.addf %90, %91 : vector<4x512xf32>
    %cst_54 = arith.constant 0.000000e+00 : f32
    %93 = vector.broadcast %cst_54 : f32 to vector<4x512xf32>
    %94 = arith.maximumf %92, %93 : vector<4x512xf32>
    %c17_i32_55 = arith.constant 17 : i32
    %95 = tpu.dynamic_rotate %94 by %c17_i32_55 dim 1 : vector<4x512xf32>, i32 -> vector<4x512xf32>
    %c0_56 = arith.constant 0 : index
    %c0_57 = arith.constant 0 : index
    %96 = vector.load %arg2[%c0_56, %c0_57] : memref<9x512xf32, #tpu.memory_space<vmem>>, vector<1x512xf32>
    %97 = vector.broadcast %96 : vector<1x512xf32> to vector<4x512xf32>
    %98 = arith.mulf %95, %97 : vector<4x512xf32>
    %cst_58 = arith.constant dense<0.000000e+00> : vector<4x512xf32>
    %99 = tpu.matmul %1, %98, %cst_58 {dimension_numbers = #tpu.dot_dimension_numbers<[1], [0], [0], [1], [0, 0, 1, 1], [], []>} : vector<4x4xf32>, vector<4x512xf32>, vector<4x512xf32> -> vector<4x512xf32>
    %c16_i32_59 = arith.constant 16 : i32
    %100 = tpu.dynamic_rotate %94 by %c16_i32_59 dim 1 : vector<4x512xf32>, i32 -> vector<4x512xf32>
    %c1_60 = arith.constant 1 : index
    %c0_61 = arith.constant 0 : index
    %101 = vector.load %arg2[%c1_60, %c0_61] : memref<9x512xf32, #tpu.memory_space<vmem>>, vector<1x512xf32>
    %102 = vector.broadcast %101 : vector<1x512xf32> to vector<4x512xf32>
    %103 = arith.mulf %100, %102 : vector<4x512xf32>
    %cst_62 = arith.constant dense<0.000000e+00> : vector<4x512xf32>
    %104 = tpu.matmul %3, %103, %cst_62 {dimension_numbers = #tpu.dot_dimension_numbers<[1], [0], [0], [1], [0, 0, 1, 1], [], []>} : vector<4x4xf32>, vector<4x512xf32>, vector<4x512xf32> -> vector<4x512xf32>
    %105 = arith.addf %99, %104 : vector<4x512xf32>
    %c15_i32_63 = arith.constant 15 : i32
    %106 = tpu.dynamic_rotate %94 by %c15_i32_63 dim 1 : vector<4x512xf32>, i32 -> vector<4x512xf32>
    %c2_64 = arith.constant 2 : index
    %c0_65 = arith.constant 0 : index
    %107 = vector.load %arg2[%c2_64, %c0_65] : memref<9x512xf32, #tpu.memory_space<vmem>>, vector<1x512xf32>
    %108 = vector.broadcast %107 : vector<1x512xf32> to vector<4x512xf32>
    %109 = arith.mulf %106, %108 : vector<4x512xf32>
    %cst_66 = arith.constant dense<0.000000e+00> : vector<4x512xf32>
    %110 = tpu.matmul %5, %109, %cst_66 {dimension_numbers = #tpu.dot_dimension_numbers<[1], [0], [0], [1], [0, 0, 1, 1], [], []>} : vector<4x4xf32>, vector<4x512xf32>, vector<4x512xf32> -> vector<4x512xf32>
    %111 = arith.addf %105, %110 : vector<4x512xf32>
    %c1_i32_67 = arith.constant 1 : i32
    %112 = tpu.dynamic_rotate %94 by %c1_i32_67 dim 1 : vector<4x512xf32>, i32 -> vector<4x512xf32>
    %c3_68 = arith.constant 3 : index
    %c0_69 = arith.constant 0 : index
    %113 = vector.load %arg2[%c3_68, %c0_69] : memref<9x512xf32, #tpu.memory_space<vmem>>, vector<1x512xf32>
    %114 = vector.broadcast %113 : vector<1x512xf32> to vector<4x512xf32>
    %115 = arith.mulf %112, %114 : vector<4x512xf32>
    %cst_70 = arith.constant dense<0.000000e+00> : vector<4x512xf32>
    %116 = tpu.matmul %7, %115, %cst_70 {dimension_numbers = #tpu.dot_dimension_numbers<[1], [0], [0], [1], [0, 0, 1, 1], [], []>} : vector<4x4xf32>, vector<4x512xf32>, vector<4x512xf32> -> vector<4x512xf32>
    %117 = arith.addf %111, %116 : vector<4x512xf32>
    %cst_71 = arith.constant dense<0.000000e+00> : vector<4x512xf32>
    %118 = tpu.matmul %9, %94, %cst_71 {dimension_numbers = #tpu.dot_dimension_numbers<[1], [0], [0], [1], [0, 0, 1, 1], [], []>} : vector<4x4xf32>, vector<4x512xf32>, vector<4x512xf32> -> vector<4x512xf32>
    %119 = arith.addf %117, %118 : vector<4x512xf32>
    %c511_i32_72 = arith.constant 511 : i32
    %120 = tpu.dynamic_rotate %94 by %c511_i32_72 dim 1 : vector<4x512xf32>, i32 -> vector<4x512xf32>
    %c5_73 = arith.constant 5 : index
    %c0_74 = arith.constant 0 : index
    %121 = vector.load %arg2[%c5_73, %c0_74] : memref<9x512xf32, #tpu.memory_space<vmem>>, vector<1x512xf32>
    %122 = vector.broadcast %121 : vector<1x512xf32> to vector<4x512xf32>
    %123 = arith.mulf %120, %122 : vector<4x512xf32>
    %cst_75 = arith.constant dense<0.000000e+00> : vector<4x512xf32>
    %124 = tpu.matmul %11, %123, %cst_75 {dimension_numbers = #tpu.dot_dimension_numbers<[1], [0], [0], [1], [0, 0, 1, 1], [], []>} : vector<4x4xf32>, vector<4x512xf32>, vector<4x512xf32> -> vector<4x512xf32>
    %125 = arith.addf %119, %124 : vector<4x512xf32>
    %c497_i32_76 = arith.constant 497 : i32
    %126 = tpu.dynamic_rotate %94 by %c497_i32_76 dim 1 : vector<4x512xf32>, i32 -> vector<4x512xf32>
    %c6_77 = arith.constant 6 : index
    %c0_78 = arith.constant 0 : index
    %127 = vector.load %arg2[%c6_77, %c0_78] : memref<9x512xf32, #tpu.memory_space<vmem>>, vector<1x512xf32>
    %128 = vector.broadcast %127 : vector<1x512xf32> to vector<4x512xf32>
    %129 = arith.mulf %126, %128 : vector<4x512xf32>
    %cst_79 = arith.constant dense<0.000000e+00> : vector<4x512xf32>
    %130 = tpu.matmul %13, %129, %cst_79 {dimension_numbers = #tpu.dot_dimension_numbers<[1], [0], [0], [1], [0, 0, 1, 1], [], []>} : vector<4x4xf32>, vector<4x512xf32>, vector<4x512xf32> -> vector<4x512xf32>
    %131 = arith.addf %125, %130 : vector<4x512xf32>
    %c496_i32_80 = arith.constant 496 : i32
    %132 = tpu.dynamic_rotate %94 by %c496_i32_80 dim 1 : vector<4x512xf32>, i32 -> vector<4x512xf32>
    %c7_81 = arith.constant 7 : index
    %c0_82 = arith.constant 0 : index
    %133 = vector.load %arg2[%c7_81, %c0_82] : memref<9x512xf32, #tpu.memory_space<vmem>>, vector<1x512xf32>
    %134 = vector.broadcast %133 : vector<1x512xf32> to vector<4x512xf32>
    %135 = arith.mulf %132, %134 : vector<4x512xf32>
    %cst_83 = arith.constant dense<0.000000e+00> : vector<4x512xf32>
    %136 = tpu.matmul %15, %135, %cst_83 {dimension_numbers = #tpu.dot_dimension_numbers<[1], [0], [0], [1], [0, 0, 1, 1], [], []>} : vector<4x4xf32>, vector<4x512xf32>, vector<4x512xf32> -> vector<4x512xf32>
    %137 = arith.addf %131, %136 : vector<4x512xf32>
    %c495_i32_84 = arith.constant 495 : i32
    %138 = tpu.dynamic_rotate %94 by %c495_i32_84 dim 1 : vector<4x512xf32>, i32 -> vector<4x512xf32>
    %c8_85 = arith.constant 8 : index
    %c0_86 = arith.constant 0 : index
    %139 = vector.load %arg2[%c8_85, %c0_86] : memref<9x512xf32, #tpu.memory_space<vmem>>, vector<1x512xf32>
    %140 = vector.broadcast %139 : vector<1x512xf32> to vector<4x512xf32>
    %141 = arith.mulf %138, %140 : vector<4x512xf32>
    %cst_87 = arith.constant dense<0.000000e+00> : vector<4x512xf32>
    %142 = tpu.matmul %17, %141, %cst_87 {dimension_numbers = #tpu.dot_dimension_numbers<[1], [0], [0], [1], [0, 0, 1, 1], [], []>} : vector<4x4xf32>, vector<4x512xf32>, vector<4x512xf32> -> vector<4x512xf32>
    %143 = arith.addf %137, %142 : vector<4x512xf32>
    %cst_88 = arith.constant dense<0.000000e+00> : vector<4xf32>
    %144 = vector.multi_reduction <add>, %143, %cst_88 [1] : vector<4x512xf32> to vector<4xf32>
    %145 = vector.shape_cast %144 : vector<4xf32> to vector<4x1xf32>
    %cst_89 = arith.constant 0.001953125 : f32
    %146 = vector.broadcast %cst_89 : f32 to vector<4x1xf32>
    %147 = arith.mulf %145, %146 : vector<4x1xf32>
    %148 = arith.mulf %143, %143 : vector<4x512xf32>
    %cst_90 = arith.constant dense<0.000000e+00> : vector<4xf32>
    %149 = vector.multi_reduction <add>, %148, %cst_90 [1] : vector<4x512xf32> to vector<4xf32>
    %150 = vector.shape_cast %149 : vector<4xf32> to vector<4x1xf32>
    %cst_91 = arith.constant 0.001953125 : f32
    %151 = vector.broadcast %cst_91 : f32 to vector<4x1xf32>
    %152 = arith.mulf %150, %151 : vector<4x1xf32>
    %153 = arith.mulf %147, %147 : vector<4x1xf32>
    %154 = arith.subf %152, %153 : vector<4x1xf32>
    %cst_92 = arith.constant 0.000000e+00 : f32
    %155 = vector.broadcast %cst_92 : f32 to vector<4x1xf32>
    %156 = arith.maximumf %154, %155 : vector<4x1xf32>
    %cst_93 = arith.constant 9.99999974E-6 : f32
    %157 = vector.broadcast %cst_93 : f32 to vector<4x1xf32>
    %158 = arith.addf %156, %157 : vector<4x1xf32>
    %159 = math.rsqrt %158 : vector<4x1xf32>
    %160 = arith.mulf %18, %159 : vector<4x1xf32>
    %161 = arith.mulf %147, %160 : vector<4x1xf32>
    %162 = arith.subf %19, %161 : vector<4x1xf32>
    %163 = vector.broadcast %160 : vector<4x1xf32> to vector<4x512xf32>
    %164 = arith.mulf %143, %163 : vector<4x512xf32>
    %165 = vector.broadcast %162 : vector<4x1xf32> to vector<4x512xf32>
    %166 = arith.addf %164, %165 : vector<4x512xf32>
    %cst_94 = arith.constant 0.000000e+00 : f32
    %167 = vector.broadcast %cst_94 : f32 to vector<4x512xf32>
    %168 = arith.maximumf %166, %167 : vector<4x512xf32>
    %c17_i32_95 = arith.constant 17 : i32
    %169 = tpu.dynamic_rotate %168 by %c17_i32_95 dim 1 : vector<4x512xf32>, i32 -> vector<4x512xf32>
    %c0_96 = arith.constant 0 : index
    %c0_97 = arith.constant 0 : index
    %170 = vector.load %arg2[%c0_96, %c0_97] : memref<9x512xf32, #tpu.memory_space<vmem>>, vector<1x512xf32>
    %171 = vector.broadcast %170 : vector<1x512xf32> to vector<4x512xf32>
    %172 = arith.mulf %169, %171 : vector<4x512xf32>
    %cst_98 = arith.constant dense<0.000000e+00> : vector<4x512xf32>
    %173 = tpu.matmul %1, %172, %cst_98 {dimension_numbers = #tpu.dot_dimension_numbers<[1], [0], [0], [1], [0, 0, 1, 1], [], []>} : vector<4x4xf32>, vector<4x512xf32>, vector<4x512xf32> -> vector<4x512xf32>
    %c16_i32_99 = arith.constant 16 : i32
    %174 = tpu.dynamic_rotate %168 by %c16_i32_99 dim 1 : vector<4x512xf32>, i32 -> vector<4x512xf32>
    %c1_100 = arith.constant 1 : index
    %c0_101 = arith.constant 0 : index
    %175 = vector.load %arg2[%c1_100, %c0_101] : memref<9x512xf32, #tpu.memory_space<vmem>>, vector<1x512xf32>
    %176 = vector.broadcast %175 : vector<1x512xf32> to vector<4x512xf32>
    %177 = arith.mulf %174, %176 : vector<4x512xf32>
    %cst_102 = arith.constant dense<0.000000e+00> : vector<4x512xf32>
    %178 = tpu.matmul %3, %177, %cst_102 {dimension_numbers = #tpu.dot_dimension_numbers<[1], [0], [0], [1], [0, 0, 1, 1], [], []>} : vector<4x4xf32>, vector<4x512xf32>, vector<4x512xf32> -> vector<4x512xf32>
    %179 = arith.addf %173, %178 : vector<4x512xf32>
    %c15_i32_103 = arith.constant 15 : i32
    %180 = tpu.dynamic_rotate %168 by %c15_i32_103 dim 1 : vector<4x512xf32>, i32 -> vector<4x512xf32>
    %c2_104 = arith.constant 2 : index
    %c0_105 = arith.constant 0 : index
    %181 = vector.load %arg2[%c2_104, %c0_105] : memref<9x512xf32, #tpu.memory_space<vmem>>, vector<1x512xf32>
    %182 = vector.broadcast %181 : vector<1x512xf32> to vector<4x512xf32>
    %183 = arith.mulf %180, %182 : vector<4x512xf32>
    %cst_106 = arith.constant dense<0.000000e+00> : vector<4x512xf32>
    %184 = tpu.matmul %5, %183, %cst_106 {dimension_numbers = #tpu.dot_dimension_numbers<[1], [0], [0], [1], [0, 0, 1, 1], [], []>} : vector<4x4xf32>, vector<4x512xf32>, vector<4x512xf32> -> vector<4x512xf32>
    %185 = arith.addf %179, %184 : vector<4x512xf32>
    %c1_i32_107 = arith.constant 1 : i32
    %186 = tpu.dynamic_rotate %168 by %c1_i32_107 dim 1 : vector<4x512xf32>, i32 -> vector<4x512xf32>
    %c3_108 = arith.constant 3 : index
    %c0_109 = arith.constant 0 : index
    %187 = vector.load %arg2[%c3_108, %c0_109] : memref<9x512xf32, #tpu.memory_space<vmem>>, vector<1x512xf32>
    %188 = vector.broadcast %187 : vector<1x512xf32> to vector<4x512xf32>
    %189 = arith.mulf %186, %188 : vector<4x512xf32>
    %cst_110 = arith.constant dense<0.000000e+00> : vector<4x512xf32>
    %190 = tpu.matmul %7, %189, %cst_110 {dimension_numbers = #tpu.dot_dimension_numbers<[1], [0], [0], [1], [0, 0, 1, 1], [], []>} : vector<4x4xf32>, vector<4x512xf32>, vector<4x512xf32> -> vector<4x512xf32>
    %191 = arith.addf %185, %190 : vector<4x512xf32>
    %cst_111 = arith.constant dense<0.000000e+00> : vector<4x512xf32>
    %192 = tpu.matmul %9, %168, %cst_111 {dimension_numbers = #tpu.dot_dimension_numbers<[1], [0], [0], [1], [0, 0, 1, 1], [], []>} : vector<4x4xf32>, vector<4x512xf32>, vector<4x512xf32> -> vector<4x512xf32>
    %193 = arith.addf %191, %192 : vector<4x512xf32>
    %c511_i32_112 = arith.constant 511 : i32
    %194 = tpu.dynamic_rotate %168 by %c511_i32_112 dim 1 : vector<4x512xf32>, i32 -> vector<4x512xf32>
    %c5_113 = arith.constant 5 : index
    %c0_114 = arith.constant 0 : index
    %195 = vector.load %arg2[%c5_113, %c0_114] : memref<9x512xf32, #tpu.memory_space<vmem>>, vector<1x512xf32>
    %196 = vector.broadcast %195 : vector<1x512xf32> to vector<4x512xf32>
    %197 = arith.mulf %194, %196 : vector<4x512xf32>
    %cst_115 = arith.constant dense<0.000000e+00> : vector<4x512xf32>
    %198 = tpu.matmul %11, %197, %cst_115 {dimension_numbers = #tpu.dot_dimension_numbers<[1], [0], [0], [1], [0, 0, 1, 1], [], []>} : vector<4x4xf32>, vector<4x512xf32>, vector<4x512xf32> -> vector<4x512xf32>
    %199 = arith.addf %193, %198 : vector<4x512xf32>
    %c497_i32_116 = arith.constant 497 : i32
    %200 = tpu.dynamic_rotate %168 by %c497_i32_116 dim 1 : vector<4x512xf32>, i32 -> vector<4x512xf32>
    %c6_117 = arith.constant 6 : index
    %c0_118 = arith.constant 0 : index
    %201 = vector.load %arg2[%c6_117, %c0_118] : memref<9x512xf32, #tpu.memory_space<vmem>>, vector<1x512xf32>
    %202 = vector.broadcast %201 : vector<1x512xf32> to vector<4x512xf32>
    %203 = arith.mulf %200, %202 : vector<4x512xf32>
    %cst_119 = arith.constant dense<0.000000e+00> : vector<4x512xf32>
    %204 = tpu.matmul %13, %203, %cst_119 {dimension_numbers = #tpu.dot_dimension_numbers<[1], [0], [0], [1], [0, 0, 1, 1], [], []>} : vector<4x4xf32>, vector<4x512xf32>, vector<4x512xf32> -> vector<4x512xf32>
    %205 = arith.addf %199, %204 : vector<4x512xf32>
    %c496_i32_120 = arith.constant 496 : i32
    %206 = tpu.dynamic_rotate %168 by %c496_i32_120 dim 1 : vector<4x512xf32>, i32 -> vector<4x512xf32>
    %c7_121 = arith.constant 7 : index
    %c0_122 = arith.constant 0 : index
    %207 = vector.load %arg2[%c7_121, %c0_122] : memref<9x512xf32, #tpu.memory_space<vmem>>, vector<1x512xf32>
    %208 = vector.broadcast %207 : vector<1x512xf32> to vector<4x512xf32>
    %209 = arith.mulf %206, %208 : vector<4x512xf32>
    %cst_123 = arith.constant dense<0.000000e+00> : vector<4x512xf32>
    %210 = tpu.matmul %15, %209, %cst_123 {dimension_numbers = #tpu.dot_dimension_numbers<[1], [0], [0], [1], [0, 0, 1, 1], [], []>} : vector<4x4xf32>, vector<4x512xf32>, vector<4x512xf32> -> vector<4x512xf32>
    %211 = arith.addf %205, %210 : vector<4x512xf32>
    %c495_i32_124 = arith.constant 495 : i32
    %212 = tpu.dynamic_rotate %168 by %c495_i32_124 dim 1 : vector<4x512xf32>, i32 -> vector<4x512xf32>
    %c8_125 = arith.constant 8 : index
    %c0_126 = arith.constant 0 : index
    %213 = vector.load %arg2[%c8_125, %c0_126] : memref<9x512xf32, #tpu.memory_space<vmem>>, vector<1x512xf32>
    %214 = vector.broadcast %213 : vector<1x512xf32> to vector<4x512xf32>
    %215 = arith.mulf %212, %214 : vector<4x512xf32>
    %cst_127 = arith.constant dense<0.000000e+00> : vector<4x512xf32>
    %216 = tpu.matmul %17, %215, %cst_127 {dimension_numbers = #tpu.dot_dimension_numbers<[1], [0], [0], [1], [0, 0, 1, 1], [], []>} : vector<4x4xf32>, vector<4x512xf32>, vector<4x512xf32> -> vector<4x512xf32>
    %217 = arith.addf %211, %216 : vector<4x512xf32>
    %cst_128 = arith.constant dense<0.000000e+00> : vector<4xf32>
    %218 = vector.multi_reduction <add>, %217, %cst_128 [1] : vector<4x512xf32> to vector<4xf32>
    %219 = vector.shape_cast %218 : vector<4xf32> to vector<4x1xf32>
    %cst_129 = arith.constant 0.001953125 : f32
    %220 = vector.broadcast %cst_129 : f32 to vector<4x1xf32>
    %221 = arith.mulf %219, %220 : vector<4x1xf32>
    %222 = arith.mulf %217, %217 : vector<4x512xf32>
    %cst_130 = arith.constant dense<0.000000e+00> : vector<4xf32>
    %223 = vector.multi_reduction <add>, %222, %cst_130 [1] : vector<4x512xf32> to vector<4xf32>
    %224 = vector.shape_cast %223 : vector<4xf32> to vector<4x1xf32>
    %cst_131 = arith.constant 0.001953125 : f32
    %225 = vector.broadcast %cst_131 : f32 to vector<4x1xf32>
    %226 = arith.mulf %224, %225 : vector<4x1xf32>
    %227 = arith.mulf %221, %221 : vector<4x1xf32>
    %228 = arith.subf %226, %227 : vector<4x1xf32>
    %cst_132 = arith.constant 0.000000e+00 : f32
    %229 = vector.broadcast %cst_132 : f32 to vector<4x1xf32>
    %230 = arith.maximumf %228, %229 : vector<4x1xf32>
    %cst_133 = arith.constant 9.99999974E-6 : f32
    %231 = vector.broadcast %cst_133 : f32 to vector<4x1xf32>
    %232 = arith.addf %230, %231 : vector<4x1xf32>
    %233 = math.rsqrt %232 : vector<4x1xf32>
    %234 = arith.mulf %18, %233 : vector<4x1xf32>
    %235 = arith.mulf %221, %234 : vector<4x1xf32>
    %236 = arith.subf %19, %235 : vector<4x1xf32>
    %237 = vector.broadcast %234 : vector<4x1xf32> to vector<4x512xf32>
    %238 = arith.mulf %217, %237 : vector<4x512xf32>
    %239 = vector.broadcast %236 : vector<4x1xf32> to vector<4x512xf32>
    %240 = arith.addf %238, %239 : vector<4x512xf32>
    %cst_134 = arith.constant 0.000000e+00 : f32
    %241 = vector.broadcast %cst_134 : f32 to vector<4x512xf32>
    %242 = arith.maximumf %240, %241 : vector<4x512xf32>
    %c0_135 = arith.constant 0 : index
    %c0_136 = arith.constant 0 : index
    %243 = vector.load %arg5[%c0_135, %c0_136] : memref<4x512xf32, #tpu.memory_space<vmem>>, vector<4x512xf32>
    tpu.vector_store %arg5[%c0_135, %c0_136], %242 {strides = array<i32>} : memref<4x512xf32, #tpu.memory_space<vmem>>, vector<4x512xf32>,
    return
  }
}

</mosaic_0001>

<bundles_post_ra>
// kernel: tpu_custom_call.1
= control target key start
LH: loop header
LB: loop body
LE: loop exit
PB: predicated region body
PF: predicated region fallthrough
CT: control target
= control target key end

     0   :  { %10 = vsyncpa [#allocation3], 0  ;;  %s6531_s0 = inlined_call_operand.hbm [shape: f32[4,512], index: 0, kind: input, shape index: {}]   ;;  %s6532_s1 = inlined_call_operand.vmem [shape: f32[9,4,4], index: 1, kind: input, shape index: {}]   ;;  %s6533_s2 = inlined_call_operand.vmem [shape: f32[9,512], index: 2, kind: input, shape index: {}]   ;;  %s6534_s3 = inlined_call_operand.vmem [shape: f32[4,1], index: 3, kind: input, shape index: {}]   ;;  %s6535_s4 = inlined_call_operand.vmem [shape: f32[4,1], index: 4, kind: input, shape index: {}]   ;;  %s6536_s5 = inlined_call_operand.hbm [shape: f32[4,512], index: 5, kind: output, shape index: {}]  }
   0x1   :  { %11 = vsyncpa [#allocation4], 0  ;;  %s5443_s18 = smov [#allocation2]   ;;  %s5395_s22 = scalar_lea.hbm %s6531_s0, 256 }
   0x2   :  { %s18_s19 = sshll.u32 %s5443_s18, 4  ;;  %p5396_p0 = scmp.ne.s32.totalorder %s6531_s0, %s5395_s22  ;;  %s19_s19 = int_to_ptr.vmem [resolvable:$true] %s18_s19 }
   0x3   :  { %p5399_p1 = scmp.lt.u32.totalorder %s5395_s22, %s6531_s0 }
   0x5   :  { %p5401_p2 = pnand %p5399_p1, %p5396_p0 }
   0x7   :  { %5404 = shalt.err (!%p5401_p2)
}
   0x8   :  { %s5405_s27 = scalar_lea.vmem %s19_s19, 256  ;;  %p5410_p4 = scmp.lt.s32.totalorder %s19_s19, %s19_s19 }
   0x9   :  { %p5406_p3 = scmp.ne.s32.totalorder %s19_s19, %s5405_s27  ;;  %p5411_p5 = scmp.lt.s32.totalorder %s5405_s27, %s5405_s27 }
   0xb   :  { %p5412_p6 = por %p5411_p5, %p5410_p4 }
   0xd   :  { %p5413_p7 = pnand %p5412_p6, %p5406_p3 }
   0xf   :  { %5416 = shalt.err (!%p5413_p7)
}
  0x10   :  { %21 = dma.hbm_to_vmem [thread:$0]  %s6531_s0, 256, %s19_s19, [#allocation3]  }
  0x11   :  { %5439 = dma.done.wait [#allocation3], 256  }
  0x12   :  { %5440 = vsyncadd [#allocation3], 4294967040  ;;  %v6537_v0 = vmov 0.0   ;;  %v5499_v1 = vld [vmem:[#allocation2] sm:$0xff]  ;;  %v5501_v2 = vld [vmem:[#allocation2 + $0x8] sm:$0xff]  ;;  %s5445_s30 = smov 16   ;;  %v68_v5 = vlaneseq }
  0x13   :  { %222 = vmatprep.mubr.f32.mxu0 %v6537_v0  ;;  %293 = vmatprep.mubr.f32.mxu1 %v6537_v0  ;;  %v5507_v3 = vcombine.high %v5501_v2, %v5501_v2  ;;  %v5511_v4 = vcombine.high %v5499_v1, %v5499_v1  ;;  %s5446_s0 = smov 17   ;;  %s5447_s6 = smov 15   ;;  %v5099_v11 = vld [vmem:[%s6533_s2 + $0x1] ss:$8 sm:$0xf]  ;;  %vm145_vm1 = vcmask 1043456  }
  0x14   :  { %101 = vrot.lane.b32.xlu0 %v5499_v1, %s5445_s30  ;;  %s5448_s7 = smov 1   ;;  %s5449_s8 = smov 127   ;;  %v78_v6 = vshrl.u32 %v68_v5, 7  ;;  %v5575_v7 = vand.u32 127, %v68_v5  ;;  %v5617_v28 = vld [vmem:[%s6532_s1 + $0x4] sm:$0xf] }
  0x15   :  { %107 = vrot.lane.b32.xlu1 %v5507_v3, %s5445_s30  ;;  %s5450_s9 = smov 113   ;;  %s5451_s10 = smov 112   ;;  %v75_v22 = vld [vmem:[%s6533_s2] ss:$8 sm:$0xf]  ;;  %vm141_vm2 = vcmask 31744  }
  0x16   :  { %s5452_s11 = smov 111   ;;  %v5577_v8 = vsub.s32 1, %v78_v6  ;;  %v5579_v9 = vsub.s32 0, %v78_v6  ;;  %v5584_v12 = vsub.s32 3, %v78_v6  ;;  %v5586_v13 = vsub.s32 2, %v78_v6 }
  0x17   :  { %vm109_vm0 = vcmp.lt.s32.totalorder %v5575_v7, 16  ;;  %vm70_vm3 = vcmp.lt.s32.totalorder %v5575_v7, 17  ;;  %v5112_v41 = vld [vmem:[%s6533_s2 + $0x2] ss:$8 sm:$0xf]  ;;  %vm465_vm4 = vcmp.lt.s32.totalorder %v5575_v7, 15 }
  0x18   :  { %103 = vrot.lane.b32.xlu0 %v5511_v4, %s5445_s30  ;;  %v5590_v15 = vrot.slane %v5099_v11, %v5577_v8  ;;  %v5593_v16 = vrot.slane %v5099_v11, %v5579_v9  ;;  %v5598_v19 = vrot.slane %v5099_v11, %v5584_v12  ;;  %v5601_v20 = vrot.slane %v5099_v11, %v5586_v13  ;;  %v5661_v46 = vld [vmem:[%s6532_s1] sm:$0xf]  ;;  %v5704_v5 = vld [vmem:[%s6532_s1 + $0x8] sm:$0xf] }
  0x19   :  { %105 = vrot.lane.b32.xlu1 %v5501_v2, %s5445_s30  ;;  %v5623_v31 = vrot.slane %v75_v22, %v5577_v8  ;;  %v5631_v34 = vrot.slane %v75_v22, %v5579_v9  ;;  %v5641_v38 = vrot.slane %v75_v22, %v5586_v13  ;;  %v5644_v39 = vrot.slane %v75_v22, %v5584_v12  ;;  %v5119_v59 = vld [vmem:[%s6533_s2 + $0x3] ss:$8 sm:$0xf] }
  0x1a   :  { %v5668_v50 = vrot.slane %v5112_v41, %v5577_v8  ;;  %v5674_v52 = vrot.slane %v5112_v41, %v5579_v9  ;;  %v5684_v56 = vrot.slane %v5112_v41, %v5586_v13  ;;  %v5687_v57 = vrot.slane %v5112_v41, %v5584_v12 }
  0x1b   :  { %vm666_vm5 = vcmp.lt.s32.totalorder %v5575_v7, 1  ;;  %vm1024_vm6 = vcmp.lt.s32.totalorder %v5575_v7, 127  ;;  %vm1225_vm7 = vcmp.lt.s32.totalorder %v5575_v7, 113  ;;  %vm1426_vm8 = vcmp.lt.s32.totalorder %v5575_v7, 112 }
  0x1c   :  { %60 = vrot.lane.b32.xlu0 %v5499_v1, %s5446_s0  ;;  %vm1627_vm9 = vcmp.lt.s32.totalorder %v5575_v7, 111  ;;  %v5394_v7 = vld [vmem:[%s6532_s1 + $0x20] sm:$0xf] }
  0x1d   :  { %62 = vrot.lane.b32.xlu1 %v5511_v4, %s5446_s0 }
  0x20   :  { %66 = vrot.lane.b32.xlu0 %v5507_v3, %s5446_s0 }
  0x21   :  { %64 = vrot.lane.b32.xlu1 %v5501_v2, %s5446_s0 }
  0x24   :  { %457 = vrot.lane.b32.xlu0 %v5499_v1, %s5447_s6 }
  0x25   :  { %459 = vrot.lane.b32.xlu1 %v5511_v4, %s5447_s6 }
  0x28   :  { %463 = vrot.lane.b32.xlu0 %v5507_v3, %s5447_s6 }
  0x29   :  { %461 = vrot.lane.b32.xlu1 %v5501_v2, %s5447_s6 }
  0x2c   :  { %658 = vrot.lane.b32.xlu0 %v5499_v1, %s5448_s7 }
  0x2d   :  { %660 = vrot.lane.b32.xlu1 %v5511_v4, %s5448_s7 }
  0x30   :  { %664 = vrot.lane.b32.xlu0 %v5507_v3, %s5448_s7 }
  0x31   :  { %662 = vrot.lane.b32.xlu1 %v5501_v2, %s5448_s7 }
  0x34   :  { %1018 = vrot.lane.b32.xlu0 %v5511_v4, %s5449_s8 }
  0x35   :  { %1020 = vrot.lane.b32.xlu1 %v5501_v2, %s5449_s8 }
  0x38   :  { %1016 = vrot.lane.b32.xlu0 %v5499_v1, %s5449_s8 }
  0x39   :  { %1022 = vrot.lane.b32.xlu1 %v5507_v3, %s5449_s8 }
  0x3c   :  { %1219 = vrot.lane.b32.xlu0 %v5511_v4, %s5450_s9 }
  0x3d   :  { %1221 = vrot.lane.b32.xlu1 %v5501_v2, %s5450_s9 }
  0x40   :  { %1217 = vrot.lane.b32.xlu0 %v5499_v1, %s5450_s9 }
  0x41   :  { %1223 = vrot.lane.b32.xlu1 %v5507_v3, %s5450_s9 }
  0x44   :  { %1420 = vrot.lane.b32.xlu0 %v5511_v4, %s5451_s10 }
  0x45   :  { %1422 = vrot.lane.b32.xlu1 %v5501_v2, %s5451_s10 }
  0x48   :  { %1418 = vrot.lane.b32.xlu0 %v5499_v1, %s5451_s10 }
  0x49   :  { %1424 = vrot.lane.b32.xlu1 %v5507_v3, %s5451_s10 }
  0x4c   :  { %1621 = vrot.lane.b32.xlu0 %v5511_v4, %s5452_s11 }
  0x4d   :  { %1623 = vrot.lane.b32.xlu1 %v5501_v2, %s5452_s11 }
  0x50   :  { %1619 = vrot.lane.b32.xlu0 %v5499_v1, %s5452_s11 }
  0x51   :  { %1625 = vrot.lane.b32.xlu1 %v5507_v3, %s5452_s11 }
  0x86   :  { %v102_v10 = vpop.permute.xlu0 %101 }
  0x87   :  { %v108_v14 = vpop.permute.xlu1 %107 }
  0x88   :  { %v113_v17 = vsel %vm109_vm0, %v108_v14, %v102_v10 }
  0x89   :  { %v137_v26 = vmul.f32 %v5593_v16, %v113_v17 }
  0x8a   :  { %v104_v18 = vpop.permute.xlu0 %103 }
  0x8b   :  { %v112_v21 = vsel %vm109_vm0, %v102_v10, %v104_v18  ;;  %v106_v23 = vpop.permute.xlu1 %105 }
  0x8c   :  { %v138_v24 = vmul.f32 %v5590_v15, %v112_v21  ;;  %v111_v25 = vsel %vm109_vm0, %v104_v18, %v106_v23  ;;  %v110_v27 = vsel %vm109_vm0, %v106_v23, %v108_v14  ;;  %v5711_v14 = vrot.slane %v5119_v59, %v5577_v8 }
  0x8d   :  { %v140_v30 = vmul.f32 %v5598_v19, %v110_v27  ;;  %v139_v32 = vmul.f32 %v5601_v20, %v111_v25  ;;  %v5717_v18 = vrot.slane %v5119_v59, %v5579_v9  ;;  %v5730_v25 = vrot.slane %v5119_v59, %v5584_v12  ;;  %v5132_v27 = vld [vmem:[%s6533_s2 + $0x5] ss:$8 sm:$0xf] }
  0x8e   :  { %5100 = vmatprep.subr.msk.mxu0 %vm145_vm1, %v138_v24  ;;  %v61_v29 = vpop.permute.xlu0 %60  ;;  %v5727_v24 = vrot.slane %v5119_v59, %v5586_v13  ;;  %v5754_v41 = vrot.slane %v5132_v27, %v5577_v8 }
  0x8f   :  { %5101 = vmatpush1.msk.msra.mxu0 %vm145_vm1, %v137_v26  ;;  %5103 = vmatprep.subr.msk.mxu1 %vm145_vm1, %v140_v30  ;;  %v63_v33 = vpop.permute.xlu1 %62 }
  0x90   :  { %5102 = vmatmul.mubr.msk.f32.vlgmr.msra.gmra.mrb[0].mxu0 %vm141_vm2, %v5617_v28  ;;  %v73_v35 = vsel %vm70_vm3, %v61_v29, %v63_v33  ;;  %5104 = vmatpush1.msk.msra.mxu1 %vm145_vm1, %v139_v32 }
  0x91   :  { %379 = vmatprep.mubr.f32.mxu0 %v6537_v0  ;;  %v98_v36 = vmul.f32 %v5623_v31, %v73_v35  ;;  %5105 = vmatmul.mubr.msk.f32.vlgmr.msra.gmra.mrb[0].mxu1 %vm141_vm2, %v5617_v28  ;;  %v5747_v35 = vld [vmem:[%s6532_s1 + $0xc] sm:$0xf] }
  0x92   :  { %v67_v37 = vpop.permute.xlu0 %66  ;;  %450 = vmatprep.mubr.f32.mxu1 %v6537_v0 }
  0x93   :  { %v74_v40 = vsel %vm70_vm3, %v67_v37, %v61_v29  ;;  %v65_v43 = vpop.permute.xlu1 %64  ;;  %5106 = vmatprep.subr.msk.mxu0 %vm145_vm1, %v98_v36 }
  0x94   :  { %v97_v42 = vmul.f32 %v5631_v34, %v74_v40  ;;  %v71_v44 = vsel %vm70_vm3, %v65_v43, %v67_v37  ;;  %v72_v45 = vsel %vm70_vm3, %v63_v33, %v65_v43 }
  0x95   :  { %v99_v47 = vmul.f32 %v5641_v38, %v72_v45  ;;  %v100_v48 = vmul.f32 %v5644_v39, %v71_v44  ;;  %v5765_v44 = vrot.slane %v5132_v27, %v5579_v9 }
  0x96   :  { %v458_v49 = vpop.permute.xlu0 %457  ;;  %5107 = vmatpush1.msk.msra.mxu0 %vm145_vm1, %v97_v42 }
  0x97   :  { %v460_v51 = vpop.permute.xlu1 %459  ;;  %5109 = vmatprep.subr.msk.mxu1 %vm145_vm1, %v100_v48 }
  0x98   :  { %5108 = vmatmul.mubr.msk.f32.vlgmr.msra.gmra.mrb[0].mxu0 %vm141_vm2, %v5661_v46  ;;  %v468_v53 = vsel %vm465_vm4, %v458_v49, %v460_v51  ;;  %5110 = vmatpush1.msk.msra.mxu1 %vm145_vm1, %v99_v47  ;;  %v5774_v47 = vrot.slane %v5132_v27, %v5584_v12 }
  0x99   :  { %576 = vmatprep.mubr.f32.mxu0 %v6537_v0  ;;  %v494_v54 = vmul.f32 %v5668_v50, %v468_v53  ;;  %5111 = vmatmul.mubr.msk.f32.vlgmr.msra.gmra.mrb[0].mxu1 %vm141_vm2, %v5661_v46 }
  0x9a   :  { %v464_v55 = vpop.permute.xlu0 %463  ;;  %647 = vmatprep.mubr.f32.mxu1 %v6537_v0 }
  0x9b   :  { %v469_v58 = vsel %vm465_vm4, %v464_v55, %v458_v49  ;;  %v462_v61 = vpop.permute.xlu1 %461  ;;  %5113 = vmatprep.subr.msk.mxu0 %vm145_vm1, %v494_v54  ;;  %v5779_v49 = vrot.slane %v5132_v27, %v5586_v13 }
  0x9c   :  { %v493_v60 = vmul.f32 %v5674_v52, %v469_v58  ;;  %v466_v62 = vsel %vm465_vm4, %v462_v61, %v464_v55  ;;  %v467_v63 = vsel %vm465_vm4, %v460_v51, %v462_v61  ;;  %v5798_v55 = vld [vmem:[%s6532_s1 + $0x10] sm:$0xf] }
  0x9d   :  { %v495_v6 = vmul.f32 %v5684_v56, %v467_v63  ;;  %v496_v10 = vmul.f32 %v5687_v57, %v466_v62 }
  0x9e   :  { %v659_v11 = vpop.permute.xlu0 %658  ;;  %5114 = vmatpush1.msk.msra.mxu0 %vm145_vm1, %v493_v60 }
  0x9f   :  { %v661_v17 = vpop.permute.xlu1 %660  ;;  %5116 = vmatprep.subr.msk.mxu1 %vm145_vm1, %v496_v10 }
  0xa0   :  { %5115 = vmatmul.mubr.msk.f32.vlgmr.msra.gmra.mrb[0].mxu0 %vm141_vm2, %v5704_v5  ;;  %v669_v21 = vsel %vm666_vm5, %v659_v11, %v661_v17  ;;  %5117 = vmatpush1.msk.msra.mxu1 %vm145_vm1, %v495_v6 }
  0xa1   :  { %777 = vmatprep.mubr.f32.mxu0 %v6537_v0  ;;  %v695_v22 = vmul.f32 %v5711_v14, %v669_v21  ;;  %5118 = vmatmul.mubr.msk.f32.vlgmr.msra.gmra.mrb[0].mxu1 %vm141_vm2, %v5704_v5 }
  0xa2   :  { %v665_v23 = vpop.permute.xlu0 %664  ;;  %848 = vmatprep.mubr.f32.mxu1 %v6537_v0 }
  0xa3   :  { %v670_v26 = vsel %vm666_vm5, %v665_v23, %v659_v11  ;;  %v663_v30 = vpop.permute.xlu1 %662  ;;  %5120 = vmatprep.subr.msk.mxu0 %vm145_vm1, %v695_v22  ;;  %v5146_v22 = vld [vmem:[%s6533_s2 + $0x7] ss:$8 sm:$0xf] }
  0xa4   :  { %v694_v29 = vmul.f32 %v5717_v18, %v670_v26  ;;  %v667_v32 = vsel %vm666_vm5, %v663_v30, %v665_v23  ;;  %v668_v33 = vsel %vm666_vm5, %v661_v17, %v663_v30  ;;  %v5841_v30 = vld [vmem:[%s6532_s1 + $0x14] sm:$0xf] }
  0xa5   :  { %v696_v36 = vmul.f32 %v5727_v24, %v668_v33  ;;  %v697_v37 = vmul.f32 %v5730_v25, %v667_v32 }
  0xa6   :  { %5121 = vmatpush1.msk.msra.mxu0 %vm145_vm1, %v694_v29  ;;  %v1019_v40 = vpop.permute.xlu0 %1018 }
  0xa7   :  { %5126 = vmatprep.subr.msk.mxu0 %vm145_vm1, %v5511_v4  ;;  %5123 = vmatprep.subr.msk.mxu1 %vm145_vm1, %v697_v37  ;;  %v1021_v42 = vpop.permute.xlu1 %1020 }
  0xa8   :  { %5122 = vmatmul.mubr.msk.f32.vlgmr.msra.gmra.mrb[0].mxu0 %vm141_vm2, %v5747_v35  ;;  %5124 = vmatpush1.msk.msra.mxu1 %vm145_vm1, %v696_v36  ;;  %v1026_v43 = vsel %vm1024_vm6, %v1019_v40, %v1021_v42  ;;  %v5846_v36 = vrot.slane %v5146_v22, %v5577_v8 }
  0xa9   :  { %5127 = vmatpush1.msk.msra.mxu0 %vm145_vm1, %v5499_v1  ;;  %5125 = vmatmul.mubr.msk.f32.vlgmr.msra.gmra.mrb[0].mxu1 %vm141_vm2, %v5747_v35  ;;  %v1053_v4 = vmul.f32 %v5754_v41, %v1026_v43  ;;  %v5139_v1 = vld [vmem:[%s6533_s2 + $0x6] ss:$8 sm:$0xf]  ;;  %v5856_v43 = vrot.slane %v5146_v22, %v5579_v9 }
  0xaa   :  { %v1017_v45 = vpop.permute.xlu0 %1016  ;;  %934 = vmatprep.mubr.f32.mxu0 %v6537_v0  ;;  %5129 = vmatprep.subr.msk.mxu1 %vm145_vm1, %v5507_v3  ;;  %v5813_v63 = vrot.slane %v5139_v1, %v5579_v9  ;;  %v5820_v11 = vrot.slane %v5139_v1, %v5584_v12  ;;  %v5826_v21 = vrot.slane %v5139_v1, %v5586_v13 }
  0xab   :  { %v1027_v48 = vsel %vm1024_vm6, %v1017_v45, %v1019_v40  ;;  %1005 = vmatprep.mubr.f32.mxu1 %v6537_v0  ;;  %v1023_v51 = vpop.permute.xlu1 %1022  ;;  %5130 = vmatpush1.msk.msra.mxu1 %vm145_vm1, %v5501_v2  ;;  %v5803_v2 = vrot.slane %v5139_v1, %v5577_v8 }
  0xac   :  { %5133 = vmatprep.subr.msk.mxu0 %vm145_vm1, %v1053_v4  ;;  %v1052_v53 = vmul.f32 %v5765_v44, %v1027_v48  ;;  %v1025_v54 = vsel %vm1024_vm6, %v1021_v42, %v1023_v51  ;;  %v1028_v3 = vsel %vm1024_vm6, %v1023_v51, %v1017_v45  ;;  %v5863_v48 = vrot.slane %v5146_v22, %v5584_v12 }
  0xad   :  { %v1055_v58 = vmul.f32 %v5774_v47, %v1028_v3  ;;  %v1054_v60 = vmul.f32 %v5779_v49, %v1025_v54  ;;  %v5869_v51 = vrot.slane %v5146_v22, %v5586_v13 }
  0xae   :  { %v1220_v59 = vpop.permute.xlu0 %1219 }
  0xaf   :  { %v1222_v61 = vpop.permute.xlu1 %1221  ;;  %5136 = vmatprep.subr.msk.mxu1 %vm145_vm1, %v1055_v58 }
  0xb0   :  { %5128 = vmatmul.mubr.msk.f32.vlgmr.msra.gmra.mrb[0].mxu0 %vm141_vm2, %v5798_v55  ;;  %v1227_v62 = vsel %vm1225_vm7, %v1220_v59, %v1222_v61 }
  0xb1   :  { %5134 = vmatpush1.msk.msra.mxu0 %vm145_vm1, %v1052_v53  ;;  %1135 = vmatprep.mubr.f32.mxu0 %v6537_v0  ;;  %v1254_v6 = vmul.f32 %v5803_v2, %v1227_v62  ;;  %v5153_v53 = vld [vmem:[%s6533_s2 + $0x20] ss:$8 sm:$0xf] }
  0xb2   :  { %5131 = vmatmul.mubr.msk.f32.vlgmr.msra.gmra.mrb[0].mxu1 %vm141_vm2, %v5798_v55  ;;  %v1218_v10 = vpop.permute.xlu0 %1217 }
  0xb3   :  { %5137 = vmatpush1.msk.msra.mxu1 %vm145_vm1, %v1054_v60  ;;  %v1228_v17 = vsel %vm1225_vm7, %v1218_v10, %v1220_v59  ;;  %1206 = vmatprep.mubr.f32.mxu1 %v6537_v0  ;;  %v1224_v23 = vpop.permute.xlu1 %1223  ;;  %v5884_v60 = vld [vmem:[%s6532_s1 + $0x18] sm:$0xf] }
  0xb4   :  { %5140 = vmatprep.subr.msk.mxu0 %vm145_vm1, %v1254_v6  ;;  %v1253_v26 = vmul.f32 %v5813_v63, %v1228_v17  ;;  %v1226_v27 = vsel %vm1225_vm7, %v1222_v61, %v1224_v23  ;;  %v1229_v29 = vsel %vm1225_vm7, %v1224_v23, %v1218_v10  ;;  %v5889_v6 = vrot.slane %v5153_v53, %v5577_v8 }
  0xb5   :  { %v1256_v32 = vmul.f32 %v5820_v11, %v1229_v29  ;;  %v1255_v37 = vmul.f32 %v5826_v21, %v1226_v27  ;;  %v5899_v23 = vrot.slane %v5153_v53, %v5579_v9  ;;  %v5906_v27 = vrot.slane %v5153_v53, %v5584_v12 }
  0xb6   :  { %v1421_v33 = vpop.permute.xlu0 %1420 }
  0xb7   :  { %v1423_v40 = vpop.permute.xlu1 %1422  ;;  %5143 = vmatprep.subr.msk.mxu1 %vm145_vm1, %v1256_v32  ;;  %v5912_v32 = vrot.slane %v5153_v53, %v5586_v13 }
  0xb8   :  { %5135 = vmatmul.mubr.msk.f32.vlgmr.msra.gmra.mrb[0].mxu0 %vm141_vm2, %v5841_v30  ;;  %v1428_v42 = vsel %vm1426_vm8, %v1421_v33, %v1423_v40 }
  0xb9   :  { %5141 = vmatpush1.msk.msra.mxu0 %vm145_vm1, %v1253_v26  ;;  %1336 = vmatprep.mubr.f32.mxu0 %v6537_v0  ;;  %v1455_v4 = vmul.f32 %v5846_v36, %v1428_v42 }
  0xba   :  { %5138 = vmatmul.mubr.msk.f32.vlgmr.msra.gmra.mrb[0].mxu1 %vm141_vm2, %v5841_v30  ;;  %v1419_v45 = vpop.permute.xlu0 %1418 }
  0xbb   :  { %5144 = vmatpush1.msk.msra.mxu1 %vm145_vm1, %v1255_v37  ;;  %v1429_v1 = vsel %vm1426_vm8, %v1419_v45, %v1421_v33  ;;  %1407 = vmatprep.mubr.f32.mxu1 %v6537_v0  ;;  %v1425_v54 = vpop.permute.xlu1 %1424 }
  0xbc   :  { %5147 = vmatprep.subr.msk.mxu0 %vm145_vm1, %v1455_v4  ;;  %v1454_v3 = vmul.f32 %v5856_v43, %v1429_v1  ;;  %v1427_v58 = vsel %vm1426_vm8, %v1423_v40, %v1425_v54  ;;  %v1430_v59 = vsel %vm1426_vm8, %v1425_v54, %v1419_v45  ;;  %v5924_v40 = vld [vmem:[%s6532_s1 + $0x1c] sm:$0xf]  ;;  %v5940_v4 = vld [vmem:[%s6532_s1 + $0x20] sm:$0xf] }
  0xbd   :  { %v1457_v61 = vmul.f32 %v5863_v48, %v1430_v59  ;;  %v1456_v10 = vmul.f32 %v5869_v51, %v1427_v58  ;;  %6541 = vst [vmem:[#allocation8_spill] sm:$0xff] %v5940_v4 }
  0xbe   :  { %v1622_v62 = vpop.permute.xlu0 %1621 }
  0xbf   :  { %v1624_v17 = vpop.permute.xlu1 %1623  ;;  %5150 = vmatprep.subr.msk.mxu1 %vm145_vm1, %v1457_v61 }
  0xc0   :  { %5142 = vmatmul.mubr.msk.f32.vlgmr.msra.gmra.mrb[0].mxu0 %vm141_vm2, %v5884_v60  ;;  %v1629_v22 = vsel %vm1627_vm9, %v1622_v62, %v1624_v17 }
  0xc1   :  { %5148 = vmatpush1.msk.msra.mxu0 %vm145_vm1, %v1454_v3  ;;  %1537 = vmatprep.mubr.f32.mxu0 %v6537_v0  ;;  %v1656_v8 = vmul.f32 %v5889_v6, %v1629_v22 }
  0xc2   :  { %5145 = vmatmul.mubr.msk.f32.vlgmr.msra.gmra.mrb[0].mxu1 %vm141_vm2, %v5884_v60  ;;  %v1620_v26 = vpop.permute.xlu0 %1619 }
  0xc3   :  { %5151 = vmatpush1.msk.msra.mxu1 %vm145_vm1, %v1456_v10  ;;  %v1630_v29 = vsel %vm1627_vm9, %v1620_v26, %v1622_v62  ;;  %1608 = vmatprep.mubr.f32.mxu1 %v6537_v0  ;;  %v1626_v9 = vpop.permute.xlu1 %1625 }
  0xc4   :  { %5154 = vmatprep.subr.msk.mxu0 %vm145_vm1, %v1656_v8  ;;  %v1655_v33 = vmul.f32 %v5899_v23, %v1630_v29  ;;  %v1628_v37 = vsel %vm1627_vm9, %v1624_v17, %v1626_v9  ;;  %v1631_v12 = vsel %vm1627_vm9, %v1626_v9, %v1620_v26 }
  0xc5   :  { %v1658_v13 = vmul.f32 %v5906_v27, %v1631_v12  ;;  %v1657_v42 = vmul.f32 %v5912_v32, %v1628_v37 }
  0xc7   :  { %5157 = vmatprep.subr.msk.mxu1 %vm145_vm1, %v1658_v13 }
  0xc8   :  { %5149 = vmatmul.mubr.msk.f32.vlgmr.msra.gmra.mrb[0].mxu0 %vm141_vm2, %v5924_v40 }
  0xc9   :  { %5155 = vmatpush1.msk.msra.mxu0 %vm145_vm1, %v1655_v33  ;;  %1738 = vmatprep.mubr.f32.mxu0 %v6537_v0 }
  0xca   :  { %5152 = vmatmul.mubr.msk.f32.vlgmr.msra.gmra.mrb[0].mxu1 %vm141_vm2, %v5924_v40 }
  0xcb   :  { %5158 = vmatpush1.msk.msra.mxu1 %vm145_vm1, %v1657_v42  ;;  %1809 = vmatprep.mubr.f32.mxu1 %v6537_v0 }
  0xd0   :  { %5156 = vmatmul.mubr.msk.f32.vlgmr.msra.gmra.mrb[0].mxu0 %vm141_vm2, %v5940_v4 }
  0xd1   :  { %1982 = vmatprep.mubr.f32.mxu0 %v6537_v0 }
  0xd2   :  { %5159 = vmatmul.mubr.msk.f32.vlgmr.msra.gmra.mrb[0].mxu1 %vm141_vm2, %v5940_v4 }
  0xd3   :  { %2053 = vmatprep.mubr.f32.mxu1 %v6537_v0 }
 0x1a3   :  { %v1740_v45 = vpop.f32.mrb[0].mxu0 }
 0x1a4   :  { %v1820_v1 = vsel %vm145_vm1, %v1740_v45, 0.0  ;;  %v1830_v53 = vmul.f32 %v1740_v45, %v1740_v45  ;;  %v1742_v54 = vpop.f32.mrb[1].mxu0 }
 0x1a5   :  { %v1821_v3 = vsel %vm145_vm1, %v1742_v54, 0.0  ;;  %v1831_v58 = vmul.f32 %v1742_v54, %v1742_v54  ;;  %v1811_v59 = vpop.f32.mrb[0].mxu1 }
 0x1a6   :  { %v1834_v61 = vsel %vm145_vm1, %v1830_v53, 0.0  ;;  %v1822_v62 = vadd.f32 %v1821_v3, %v1820_v1  ;;  %v1823_v10 = vsel %vm145_vm1, %v1811_v59, 0.0  ;;  %v1832_v17 = vmul.f32 %v1811_v59, %v1811_v59  ;;  %v1813_v22 = vpop.f32.mrb[1].mxu1 }
 0x1a7   :  { %v1835_v8 = vsel %vm145_vm1, %v1831_v58, 0.0  ;;  %v1833_v26 = vmul.f32 %v1813_v22, %v1813_v22  ;;  %v1825_v37 = vsel %vm145_vm1, %v1813_v22, 0.0  ;;  %v5453_v1 = vmov 0  }
 0x1a8   :  { %v1824_v29 = vadd.f32 %v1823_v10, %v1822_v62  ;;  %v1836_v9 = vadd.f32 %v1835_v8, %v1834_v61  ;;  %v1837_v33 = vsel %vm145_vm1, %v1832_v17, 0.0  ;;  %5376 = vset.pattern.permute.xlu0 %v5453_v1  ;;  %5377 = vset.pattern.permute.xlu1 %v5453_v1  ;;  %v5959_v8 = vld [vmem:[%s6534_s3] sm:$0xf] }
 0x1a9   :  { %v1839_v42 = vsel %vm145_vm1, %v1833_v26, 0.0 }
 0x1aa   :  { %v1826_v12 = vadd.f32 %v1825_v37, %v1824_v29  ;;  %v1838_v13 = vadd.f32 %v1837_v33, %v1836_v9  ;;  %v5965_v9 = vld [vmem:[%s6535_s4] sm:$0xf] }
 0x1ac   :  { %1827 = vadd.xlane.f32.xlu0 %v1826_v12  ;;  %v1840_v53 = vadd.f32 %v1839_v42, %v1838_v13 }
 0x1ae   :  { %1841 = vadd.xlane.f32.xlu1 %v1840_v53 }
 0x239   :  { %v1828_v3 = vpop.xlane.xlu0 %1827 }
 0x23a   :  { %v1829_v0 = vmul.f32 0.001953125, %v1828_v3 }
 0x23b   :  { %v1842_v58 = vpop.xlane.xlu1 %1841 }
 0x23c   :  { %v1844_v4 = vmul.f32 %v1829_v0, %v1829_v0  ;;  %v1843_v62 = vmul.f32 0.001953125, %v1842_v58 }
 0x23e   :  { %v1845_v61 = vsub.f32 %v1843_v62, %v1844_v4 }
 0x240   :  { %v1846_v10 = vmax.f32 %v1845_v61, 0.0 }
 0x242   :  { %v1847_v17 = vadd.f32 1e-05, %v1846_v10 }
 0x244   :  { %5380 = vrsqrt.f32 %v1847_v17 }
 0x24e   :  { %v5381_v26 = vpop.eup %5380 }
 0x24f   :  { %v1849_v29 = vmul.f32 %v5381_v26, %v5959_v8 }
 0x251   :  { %1854 = vperm.xlu0 %5376, %v1849_v29   ;;  %v1850_v33 = vmul.f32 %v1849_v29, %v1829_v0 }
 0x253   :  { %v1851_v4 = vsub.f32 %v5965_v9, %v1850_v33 }
 0x255   :  { %1863 = vperm.xlu1 %5377, %v1851_v4  }
 0x2d0   :  { %v1855_v37 = vpop.permute.xlu0 %1854 }
 0x2d1   :  { %v1857_v12 = vmul.f32 %v1855_v37, %v1740_v45  ;;  %v1860_v13 = vmul.f32 %v1855_v37, %v1813_v22  ;;  %v1858_v53 = vmul.f32 %v1855_v37, %v1742_v54  ;;  %v1859_v10 = vmul.f32 %v1855_v37, %v1811_v59 }
 0x2d4   :  { %v1864_v42 = vpop.permute.xlu1 %1863 }
 0x2d5   :  { %v1866_v1 = vadd.f32 %v1864_v42, %v1857_v12  ;;  %v1869_v3 = vadd.f32 %v1864_v42, %v1860_v13  ;;  %v1867_v58 = vadd.f32 %v1864_v42, %v1858_v53  ;;  %v1868_v45 = vadd.f32 %v1864_v42, %v1859_v10 }
 0x2d7   :  { %v5968_v62 = vmax.f32 %v1866_v1, 0.0  ;;  %v5970_v61 = vmax.f32 %v1869_v3, 0.0  ;;  %v5976_v0 = vmax.f32 %v1867_v58, 0.0  ;;  %v5986_v54 = vmax.f32 %v1868_v45, 0.0 }
 0x2d8   :  { %v6542_v45 = vmov 0.0  }
 0x2d9   :  { %1880 = vrot.lane.b32.xlu0 %v5970_v61, %s5446_s0  ;;  %1890 = vrot.lane.b32.xlu1 %v5968_v62, %s5445_s30 }
 0x2dd   :  { %2214 = vrot.lane.b32.xlu0 %v5968_v62, %s5447_s6  ;;  %1892 = vrot.lane.b32.xlu1 %v5976_v0, %s5445_s30 }
 0x2e1   :  { %2220 = vrot.lane.b32.xlu0 %v5970_v61, %s5447_s6  ;;  %1896 = vrot.lane.b32.xlu1 %v5970_v61, %s5445_s30 }
 0x2e5   :  { %2388 = vrot.lane.b32.xlu0 %v5968_v62, %s5448_s7  ;;  %1894 = vrot.lane.b32.xlu1 %v5986_v54, %s5445_s30 }
 0x2e9   :  { %2394 = vrot.lane.b32.xlu0 %v5970_v61, %s5448_s7  ;;  %1874 = vrot.lane.b32.xlu1 %v5968_v62, %s5446_s0 }
 0x2ed   :  { %2722 = vrot.lane.b32.xlu0 %v5976_v0, %s5449_s8  ;;  %1876 = vrot.lane.b32.xlu1 %v5976_v0, %s5446_s0 }
 0x2f1   :  { %2720 = vrot.lane.b32.xlu0 %v5968_v62, %s5449_s8  ;;  %1878 = vrot.lane.b32.xlu1 %v5986_v54, %s5446_s0 }
 0x2f5   :  { %2896 = vrot.lane.b32.xlu0 %v5976_v0, %s5450_s9  ;;  %2216 = vrot.lane.b32.xlu1 %v5976_v0, %s5447_s6 }
 0x2f9   :  { %2894 = vrot.lane.b32.xlu0 %v5968_v62, %s5450_s9  ;;  %2218 = vrot.lane.b32.xlu1 %v5986_v54, %s5447_s6 }
 0x2fd   :  { %3070 = vrot.lane.b32.xlu0 %v5976_v0, %s5451_s10  ;;  %2390 = vrot.lane.b32.xlu1 %v5976_v0, %s5448_s7 }
 0x301   :  { %3068 = vrot.lane.b32.xlu0 %v5968_v62, %s5451_s10  ;;  %2392 = vrot.lane.b32.xlu1 %v5986_v54, %s5448_s7 }
 0x305   :  { %3244 = vrot.lane.b32.xlu0 %v5976_v0, %s5452_s11  ;;  %2724 = vrot.lane.b32.xlu1 %v5986_v54, %s5449_s8 }
 0x309   :  { %3242 = vrot.lane.b32.xlu0 %v5968_v62, %s5452_s11  ;;  %2726 = vrot.lane.b32.xlu1 %v5970_v61, %s5449_s8 }
 0x30d   :  { %2898 = vrot.lane.b32.xlu1 %v5986_v54, %s5450_s9 }
 0x311   :  { %2900 = vrot.lane.b32.xlu1 %v5970_v61, %s5450_s9 }
 0x315   :  { %3072 = vrot.lane.b32.xlu1 %v5986_v54, %s5451_s10 }
 0x319   :  { %3074 = vrot.lane.b32.xlu1 %v5970_v61, %s5451_s10 }
 0x31d   :  { %3246 = vrot.lane.b32.xlu1 %v5986_v54, %s5452_s11 }
 0x321   :  { %3248 = vrot.lane.b32.xlu1 %v5970_v61, %s5452_s11 }
 0x34b   :  { %v1881_v59 = vpop.permute.xlu0 %1880  ;;  %v1891_v22 = vpop.permute.xlu1 %1890 }
 0x34f   :  { %v2215_v17 = vpop.permute.xlu0 %2214  ;;  %v1893_v26 = vpop.permute.xlu1 %1892 }
 0x350   :  { %v1900_v29 = vsel %vm109_vm0, %v1891_v22, %v1893_v26 }
 0x351   :  { %v1903_v33 = vmul.f32 %v1900_v29, %v5590_v15 }
 0x353   :  { %v2221_v4 = vpop.permute.xlu0 %2220  ;;  %5160 = vmatprep.subr.msk.mxu0 %vm145_vm1, %v1903_v33  ;;  %v1897_v37 = vpop.permute.xlu1 %1896 }
 0x354   :  { %v1901_v12 = vsel %vm109_vm0, %v1897_v37, %v1891_v22 }
 0x355   :  { %v1902_v13 = vmul.f32 %v1901_v12, %v5593_v16 }
 0x357   :  { %5161 = vmatpush1.msk.msra.mxu0 %vm145_vm1, %v1902_v13  ;;  %v1895_v42 = vpop.permute.xlu1 %1894  ;;  %v2389_v53 = vpop.permute.xlu0 %2388 }
 0x358   :  { %v1898_v1 = vsel %vm109_vm0, %v1895_v42, %v1897_v37  ;;  %v1899_v3 = vsel %vm109_vm0, %v1893_v26, %v1895_v42  ;;  %5162 = vmatmul.mubr.msk.f32.vlgmr.msra.gmra.mrb[2].mxu0 %vm141_vm2, %v5617_v28 }
 0x359   :  { %v1904_v58 = vmul.f32 %v1899_v3, %v5601_v20  ;;  %v1905_v10 = vmul.f32 %v1898_v1, %v5598_v19  ;;  %2136 = vmatprep.mubr.f32.mxu0 %v6542_v45 }
 0x35b   :  { %5163 = vmatprep.subr.msk.mxu1 %vm145_vm1, %v1905_v10  ;;  %v1875_v22 = vpop.permute.xlu1 %1874  ;;  %v2395_v29 = vpop.permute.xlu0 %2394 }
 0x35c   :  { %5164 = vmatpush1.msk.msra.mxu1 %vm145_vm1, %v1904_v58  ;;  %v1885_v26 = vsel %vm70_vm3, %v1881_v59, %v1875_v22 }
 0x35d   :  { %5165 = vmatmul.mubr.msk.f32.vlgmr.msra.gmra.mrb[2].mxu1 %vm141_vm2, %v5617_v28  ;;  %v1886_v13 = vmul.f32 %v1885_v26, %v5631_v34 }
 0x35e   :  { %2207 = vmatprep.mubr.f32.mxu1 %v6542_v45 }
 0x35f   :  { %v1877_v33 = vpop.permute.xlu1 %1876  ;;  %v2723_v1 = vpop.permute.xlu0 %2722 }
 0x360   :  { %v1884_v37 = vsel %vm70_vm3, %v1875_v22, %v1877_v33  ;;  %v2225_v22 = vsel %vm465_vm4, %v2221_v4, %v2215_v17 }
 0x361   :  { %v1887_v12 = vmul.f32 %v1884_v37, %v5623_v31  ;;  %v2226_v37 = vmul.f32 %v2225_v22, %v5674_v52 }
 0x363   :  { %5166 = vmatprep.subr.msk.mxu0 %vm145_vm1, %v1887_v12  ;;  %v1879_v42 = vpop.permute.xlu1 %1878  ;;  %v2721_v12 = vpop.permute.xlu0 %2720 }
 0x364   :  { %v1882_v28 = vsel %vm70_vm3, %v1879_v42, %v1881_v59  ;;  %v1883_v3 = vsel %vm70_vm3, %v1877_v33, %v1879_v42  ;;  %5167 = vmatpush1.msk.msra.mxu0 %vm145_vm1, %v1886_v13 }
 0x365   :  { %v1888_v58 = vmul.f32 %v1883_v3, %v5641_v38  ;;  %v1889_v10 = vmul.f32 %v1882_v28, %v5644_v39  ;;  %5168 = vmatmul.mubr.msk.f32.vlgmr.msra.gmra.mrb[2].mxu0 %vm141_vm2, %v5661_v46  ;;  %v2399_v3 = vsel %vm666_vm5, %v2395_v29, %v2389_v53 }
 0x366   :  { %2306 = vmatprep.mubr.f32.mxu0 %v6542_v45 }
 0x367   :  { %5169 = vmatprep.subr.msk.mxu1 %vm145_vm1, %v1889_v10  ;;  %v2217_v59 = vpop.permute.xlu1 %2216 }
 0x368   :  { %v2224_v26 = vsel %vm465_vm4, %v2215_v17, %v2217_v59  ;;  %5170 = vmatpush1.msk.msra.mxu1 %vm145_vm1, %v1888_v58  ;;  %v2897_v58 = vpop.permute.xlu0 %2896 }
 0x369   :  { %v2227_v33 = vmul.f32 %v2224_v26, %v5668_v50  ;;  %5171 = vmatmul.mubr.msk.f32.vlgmr.msra.gmra.mrb[2].mxu1 %vm141_vm2, %v5661_v46 }
 0x36a   :  { %2377 = vmatprep.mubr.f32.mxu1 %v6542_v45 }
 0x36b   :  { %5172 = vmatprep.subr.msk.mxu0 %vm145_vm1, %v2227_v33  ;;  %v2219_v13 = vpop.permute.xlu1 %2218 }
 0x36c   :  { %v2222_v42 = vsel %vm465_vm4, %v2219_v13, %v2221_v4  ;;  %v2223_v17 = vsel %vm465_vm4, %v2217_v59, %v2219_v13  ;;  %5173 = vmatpush1.msk.msra.mxu0 %vm145_vm1, %v2226_v37  ;;  %v2400_v59 = vmul.f32 %v2399_v3, %v5717_v18 }
 0x36d   :  { %v2228_v28 = vmul.f32 %v2223_v17, %v5684_v56  ;;  %v2229_v46 = vmul.f32 %v2222_v42, %v5687_v57  ;;  %5174 = vmatmul.mubr.msk.f32.vlgmr.msra.gmra.mrb[2].mxu0 %vm141_vm2, %v5704_v5  ;;  %v2730_v17 = vsel %vm1024_vm6, %v2721_v12, %v2723_v1 }
 0x36e   :  { %2480 = vmatprep.mubr.f32.mxu0 %v6542_v45 }
 0x36f   :  { %5175 = vmatprep.subr.msk.mxu1 %vm145_vm1, %v2229_v46  ;;  %v2391_v4 = vpop.permute.xlu1 %2390 }
 0x370   :  { %v2398_v10 = vsel %vm666_vm5, %v2389_v53, %v2391_v4  ;;  %5176 = vmatpush1.msk.msra.mxu1 %vm145_vm1, %v2228_v28 }
 0x371   :  { %v2401_v22 = vmul.f32 %v2398_v10, %v5711_v14  ;;  %5177 = vmatmul.mubr.msk.f32.vlgmr.msra.gmra.mrb[2].mxu1 %vm141_vm2, %v5704_v5  ;;  %v2895_v5 = vpop.permute.xlu0 %2894 }
 0x372   :  { %2551 = vmatprep.mubr.f32.mxu1 %v6542_v45 }
 0x373   :  { %5178 = vmatprep.subr.msk.mxu0 %vm145_vm1, %v2401_v22  ;;  %v2393_v26 = vpop.permute.xlu1 %2392 }
 0x374   :  { %v2396_v33 = vsel %vm666_vm5, %v2393_v26, %v2395_v29  ;;  %v2397_v53 = vsel %vm666_vm5, %v2391_v4, %v2393_v26  ;;  %5179 = vmatpush1.msk.msra.mxu0 %vm145_vm1, %v2400_v59  ;;  %v2904_v4 = vsel %vm1225_vm7, %v2895_v5, %v2897_v58 }
 0x375   :  { %v2402_v37 = vmul.f32 %v2397_v53, %v5727_v24  ;;  %v2403_v13 = vmul.f32 %v2396_v33, %v5730_v25  ;;  %5180 = vmatmul.mubr.msk.f32.vlgmr.msra.gmra.mrb[2].mxu0 %vm141_vm2, %v5747_v35  ;;  %5184 = vmatprep.subr.msk.mxu0 %vm145_vm1, %v5976_v0  ;;  %v2732_v0 = vmul.f32 %v2730_v17, %v5765_v44  ;;  %v3071_v46 = vpop.permute.xlu0 %3070 }
 0x376   :  { %5185 = vmatpush1.msk.msra.mxu0 %vm145_vm1, %v5968_v62  ;;  %2638 = vmatprep.mubr.f32.mxu0 %v6542_v45  ;;  %v2906_v26 = vmul.f32 %v2904_v4, %v5813_v63 }
 0x377   :  { %5181 = vmatprep.subr.msk.mxu1 %vm145_vm1, %v2403_v13  ;;  %v2725_v29 = vpop.permute.xlu1 %2724 }
 0x378   :  { %v2729_v42 = vsel %vm1024_vm6, %v2723_v1, %v2725_v29  ;;  %5182 = vmatpush1.msk.msra.mxu1 %vm145_vm1, %v2402_v37 }
 0x379   :  { %v2733_v28 = vmul.f32 %v2729_v42, %v5754_v41  ;;  %5183 = vmatmul.mubr.msk.f32.vlgmr.msra.gmra.mrb[2].mxu1 %vm141_vm2, %v5747_v35  ;;  %5187 = vmatprep.subr.msk.mxu1 %vm145_vm1, %v5970_v61  ;;  %v3069_v22 = vpop.permute.xlu0 %3068 }
 0x37a   :  { %5188 = vmatpush1.msk.msra.mxu1 %vm145_vm1, %v5986_v54  ;;  %2709 = vmatprep.mubr.f32.mxu1 %v6542_v45 }
 0x37b   :  { %5190 = vmatprep.subr.msk.mxu0 %vm145_vm1, %v2733_v28  ;;  %v2727_v62 = vpop.permute.xlu1 %2726 }
 0x37c   :  { %v2731_v1 = vsel %vm1024_vm6, %v2727_v62, %v2721_v12  ;;  %v2728_v35 = vsel %vm1024_vm6, %v2725_v29, %v2727_v62  ;;  %v3078_v29 = vsel %vm1426_vm8, %v3069_v22, %v3071_v46 }
 0x37d   :  { %v2735_v3 = vmul.f32 %v2731_v1, %v5774_v47  ;;  %5186 = vmatmul.mubr.msk.f32.vlgmr.msra.gmra.mrb[2].mxu0 %vm141_vm2, %v5798_v55  ;;  %v2734_v54 = vmul.f32 %v2728_v35, %v5779_v49  ;;  %v3245_v37 = vpop.permute.xlu0 %3244  ;;  %v3080_v28 = vmul.f32 %v3078_v29, %v5856_v43 }
 0x37e   :  { %5191 = vmatpush1.msk.msra.mxu0 %vm145_vm1, %v2732_v0  ;;  %2812 = vmatprep.mubr.f32.mxu0 %v6542_v45 }
 0x37f   :  { %5193 = vmatprep.subr.msk.mxu1 %vm145_vm1, %v2735_v3  ;;  %v2899_v61 = vpop.permute.xlu1 %2898 }
 0x380   :  { %v2903_v12 = vsel %vm1225_vm7, %v2897_v58, %v2899_v61 }
 0x381   :  { %v2907_v10 = vmul.f32 %v2903_v12, %v5803_v2  ;;  %5189 = vmatmul.mubr.msk.f32.vlgmr.msra.gmra.mrb[2].mxu1 %vm141_vm2, %v5798_v55 }
 0x382   :  { %5194 = vmatpush1.msk.msra.mxu1 %vm145_vm1, %v2734_v54  ;;  %2883 = vmatprep.mubr.f32.mxu1 %v6542_v45 }
 0x383   :  { %5196 = vmatprep.subr.msk.mxu0 %vm145_vm1, %v2907_v10  ;;  %v2901_v59 = vpop.permute.xlu1 %2900 }
 0x384   :  { %v2905_v33 = vsel %vm1225_vm7, %v2901_v59, %v2895_v5  ;;  %v2902_v58 = vsel %vm1225_vm7, %v2899_v61, %v2901_v59 }
 0x385   :  { %v2909_v53 = vmul.f32 %v2905_v33, %v5820_v11  ;;  %5192 = vmatmul.mubr.msk.f32.vlgmr.msra.gmra.mrb[2].mxu0 %vm141_vm2, %v5841_v30  ;;  %v2908_v13 = vmul.f32 %v2902_v58, %v5826_v21 }
 0x386   :  { %5197 = vmatpush1.msk.msra.mxu0 %vm145_vm1, %v2906_v26  ;;  %2986 = vmatprep.mubr.f32.mxu0 %v6542_v45  ;;  %v6543_v26 = vld [vmem:[#allocation8_spill] sm:$0xff] }
 0x387   :  { %5199 = vmatprep.subr.msk.mxu1 %vm145_vm1, %v2909_v53  ;;  %v3073_v55 = vpop.permute.xlu1 %3072 }
 0x388   :  { %v3077_v5 = vsel %vm1426_vm8, %v3071_v46, %v3073_v55 }
 0x389   :  { %v3081_v42 = vmul.f32 %v3077_v5, %v5846_v36  ;;  %5195 = vmatmul.mubr.msk.f32.vlgmr.msra.gmra.mrb[2].mxu1 %vm141_vm2, %v5841_v30  ;;  %v3243_v30 = vpop.permute.xlu0 %3242 }
 0x38a   :  { %5200 = vmatpush1.msk.msra.mxu1 %vm145_vm1, %v2908_v13  ;;  %3057 = vmatprep.mubr.f32.mxu1 %v6542_v45  ;;  %v3252_v61 = vsel %vm1627_vm9, %v3243_v30, %v3245_v37 }
 0x38b   :  { %5202 = vmatprep.subr.msk.mxu0 %vm145_vm1, %v3081_v42  ;;  %v3075_v17 = vpop.permute.xlu1 %3074  ;;  %v3254_v4 = vmul.f32 %v3252_v61, %v5899_v23 }
 0x38c   :  { %v3079_v62 = vsel %vm1426_vm8, %v3075_v17, %v3069_v22  ;;  %v3076_v0 = vsel %vm1426_vm8, %v3073_v55, %v3075_v17 }
 0x38d   :  { %v3083_v46 = vmul.f32 %v3079_v62, %v5863_v48  ;;  %5198 = vmatmul.mubr.msk.f32.vlgmr.msra.gmra.mrb[2].mxu0 %vm141_vm2, %v5884_v60  ;;  %v3082_v35 = vmul.f32 %v3076_v0, %v5869_v51 }
 0x38e   :  { %5203 = vmatpush1.msk.msra.mxu0 %vm145_vm1, %v3080_v28  ;;  %3160 = vmatprep.mubr.f32.mxu0 %v6542_v45 }
 0x38f   :  { %5205 = vmatprep.subr.msk.mxu1 %vm145_vm1, %v3083_v46  ;;  %v3247_v1 = vpop.permute.xlu1 %3246 }
 0x390   :  { %v3251_v3 = vsel %vm1627_vm9, %v3245_v37, %v3247_v1 }
 0x391   :  { %v3255_v54 = vmul.f32 %v3251_v3, %v5889_v6  ;;  %5201 = vmatmul.mubr.msk.f32.vlgmr.msra.gmra.mrb[2].mxu1 %vm141_vm2, %v5884_v60 }
 0x392   :  { %5206 = vmatpush1.msk.msra.mxu1 %vm145_vm1, %v3082_v35  ;;  %3231 = vmatprep.mubr.f32.mxu1 %v6542_v45 }
 0x393   :  { %5208 = vmatprep.subr.msk.mxu0 %vm145_vm1, %v3255_v54  ;;  %v3249_v12 = vpop.permute.xlu1 %3248 }
 0x394   :  { %v3253_v10 = vsel %vm1627_vm9, %v3249_v12, %v3243_v30  ;;  %v3250_v22 = vsel %vm1627_vm9, %v3247_v1, %v3249_v12 }
 0x395   :  { %v3257_v59 = vmul.f32 %v3253_v10, %v5906_v27  ;;  %5204 = vmatmul.mubr.msk.f32.vlgmr.msra.gmra.mrb[2].mxu0 %vm141_vm2, %v5924_v40  ;;  %v3256_v60 = vmul.f32 %v3250_v22, %v5912_v32 }
 0x396   :  { %5209 = vmatpush1.msk.msra.mxu0 %vm145_vm1, %v3254_v4  ;;  %3334 = vmatprep.mubr.f32.mxu0 %v6542_v45 }
 0x397   :  { %5211 = vmatprep.subr.msk.mxu1 %vm145_vm1, %v3257_v59 }
 0x399   :  { %5207 = vmatmul.mubr.msk.f32.vlgmr.msra.gmra.mrb[2].mxu1 %vm141_vm2, %v5924_v40 }
 0x39a   :  { %5212 = vmatpush1.msk.msra.mxu1 %vm145_vm1, %v3256_v60  ;;  %3405 = vmatprep.mubr.f32.mxu1 %v6542_v45 }
 0x39d   :  { %5210 = vmatmul.mubr.msk.f32.vlgmr.msra.gmra.mrb[2].mxu0 %vm141_vm2, %v6543_v26 }
 0x39e   :  { %3578 = vmatprep.mubr.f32.mxu0 %v6542_v45 }
 0x3a1   :  { %5213 = vmatmul.mubr.msk.f32.vlgmr.msra.gmra.mrb[2].mxu1 %vm141_vm2, %v6543_v26 }
 0x3a2   :  { %3649 = vmatprep.mubr.f32.mxu1 %v6542_v45 }
 0x470   :  { %v3336_v33 = vpop.f32.mrb[2].mxu0 }
 0x471   :  { %v3416_v58 = vsel %vm145_vm1, %v3336_v33, 0.0  ;;  %v3426_v53 = vmul.f32 %v3336_v33, %v3336_v33  ;;  %v3338_v55 = vpop.f32.mrb[3].mxu0 }
 0x472   :  { %v3417_v40 = vsel %vm145_vm1, %v3338_v55, 0.0  ;;  %v3427_v37 = vmul.f32 %v3338_v55, %v3338_v55 }
 0x473   :  { %v3430_v13 = vsel %vm145_vm1, %v3426_v53, 0.0  ;;  %v3418_v5 = vadd.f32 %v3417_v40, %v3416_v58 }
 0x474   :  { %v3431_v29 = vsel %vm145_vm1, %v3427_v37, 0.0  ;;  %v3407_v42 = vpop.f32.mrb[2].mxu1 }
 0x475   :  { %v3419_v17 = vsel %vm145_vm1, %v3407_v42, 0.0  ;;  %v3428_v28 = vmul.f32 %v3407_v42, %v3407_v42  ;;  %v3409_v62 = vpop.f32.mrb[3].mxu1  ;;  %v3432_v0 = vadd.f32 %v3431_v29, %v3430_v13 }
 0x476   :  { %v3429_v46 = vmul.f32 %v3409_v62, %v3409_v62  ;;  %v3420_v30 = vadd.f32 %v3419_v17, %v3418_v5  ;;  %v3421_v1 = vsel %vm145_vm1, %v3409_v62, 0.0 }
 0x477   :  { %v3433_v35 = vsel %vm145_vm1, %v3428_v28, 0.0 }
 0x478   :  { %v3422_v3 = vadd.f32 %v3421_v1, %v3420_v30  ;;  %v3434_v61 = vadd.f32 %v3433_v35, %v3432_v0  ;;  %v3435_v54 = vsel %vm145_vm1, %v3429_v46, 0.0 }
 0x47a   :  { %3423 = vadd.xlane.f32.xlu0 %v3422_v3  ;;  %v3436_v12 = vadd.f32 %v3435_v54, %v3434_v61 }
 0x47c   :  { %3437 = vadd.xlane.f32.xlu1 %v3436_v12 }
 0x507   :  { %v3424_v4 = vpop.xlane.xlu0 %3423 }
 0x508   :  { %v3425_v10 = vmul.f32 0.001953125, %v3424_v4 }
 0x509   :  { %v3438_v22 = vpop.xlane.xlu1 %3437 }
 0x50a   :  { %v3440_v59 = vmul.f32 %v3425_v10, %v3425_v10  ;;  %v3439_v60 = vmul.f32 0.001953125, %v3438_v22 }
 0x50c   :  { %v3441_v26 = vsub.f32 %v3439_v60, %v3440_v59 }
 0x50e   :  { %v3442_v58 = vmax.f32 %v3441_v26, 0.0 }
 0x510   :  { %v3443_v53 = vadd.f32 1e-05, %v3442_v58 }
 0x512   :  { %5382 = vrsqrt.f32 %v3443_v53 }
 0x51c   :  { %v5383_v40 = vpop.eup %5382 }
 0x51d   :  { %v3445_v37 = vmul.f32 %v5383_v40, %v5959_v8 }
 0x51f   :  { %3450 = vperm.xlu0 %5376, %v3445_v37   ;;  %v3446_v13 = vmul.f32 %v3445_v37, %v3425_v10 }
 0x521   :  { %v3447_v5 = vsub.f32 %v5965_v9, %v3446_v13 }
 0x523   :  { %3459 = vperm.xlu1 %5377, %v3447_v5  }
 0x59e   :  { %v3451_v29 = vpop.permute.xlu0 %3450 }
 0x59f   :  { %v3453_v17 = vmul.f32 %v3451_v29, %v3336_v33  ;;  %v3454_v28 = vmul.f32 %v3451_v29, %v3338_v55  ;;  %v3455_v46 = vmul.f32 %v3451_v29, %v3407_v42  ;;  %v3456_v30 = vmul.f32 %v3451_v29, %v3409_v62  ;;  %v5386_v29 = vld [vmem:[%s6532_s1 + $0x4] sm:$0xf] }
 0x5a2   :  { %v3460_v0 = vpop.permute.xlu1 %3459 }
 0x5a3   :  { %v3462_v1 = vadd.f32 %v3460_v0, %v3453_v17  ;;  %v3463_v35 = vadd.f32 %v3460_v0, %v3454_v28  ;;  %v3464_v3 = vadd.f32 %v3460_v0, %v3455_v46  ;;  %v3465_v61 = vadd.f32 %v3460_v0, %v3456_v30 }
 0x5a5   :  { %v6240_v54 = vmax.f32 %v3462_v1, 0.0  ;;  %v6242_v12 = vmax.f32 %v3463_v35, 0.0  ;;  %v6248_v4 = vmax.f32 %v3464_v3, 0.0  ;;  %v6250_v33 = vmax.f32 %v3465_v61, 0.0  ;;  %v5387_v61 = vld [vmem:[%s6532_s1] sm:$0xf] }
 0x5a7   :  { %3488 = vrot.lane.b32.xlu1 %v6242_v12, %s5445_s30  ;;  %3486 = vrot.lane.b32.xlu0 %v6240_v54, %s5445_s30 }
 0x5ab   :  { %3490 = vrot.lane.b32.xlu1 %v6248_v4, %s5445_s30  ;;  %3492 = vrot.lane.b32.xlu0 %v6250_v33, %s5445_s30 }
 0x5af   :  { %3472 = vrot.lane.b32.xlu1 %v6242_v12, %s5446_s0  ;;  %3470 = vrot.lane.b32.xlu0 %v6240_v54, %s5446_s0 }
 0x5b3   :  { %3474 = vrot.lane.b32.xlu1 %v6248_v4, %s5446_s0  ;;  %3476 = vrot.lane.b32.xlu0 %v6250_v33, %s5446_s0 }
 0x5b7   :  { %3812 = vrot.lane.b32.xlu1 %v6242_v12, %s5447_s6  ;;  %3810 = vrot.lane.b32.xlu0 %v6240_v54, %s5447_s6 }
 0x5bb   :  { %3814 = vrot.lane.b32.xlu1 %v6248_v4, %s5447_s6  ;;  %3816 = vrot.lane.b32.xlu0 %v6250_v33, %s5447_s6 }
 0x5bf   :  { %3986 = vrot.lane.b32.xlu1 %v6242_v12, %s5448_s7  ;;  %3984 = vrot.lane.b32.xlu0 %v6240_v54, %s5448_s7 }
 0x5c3   :  { %3988 = vrot.lane.b32.xlu1 %v6248_v4, %s5448_s7  ;;  %3990 = vrot.lane.b32.xlu0 %v6250_v33, %s5448_s7 }
 0x5c7   :  { %4320 = vrot.lane.b32.xlu1 %v6248_v4, %s5449_s8  ;;  %4318 = vrot.lane.b32.xlu0 %v6242_v12, %s5449_s8 }
 0x5cb   :  { %4322 = vrot.lane.b32.xlu1 %v6250_v33, %s5449_s8  ;;  %4316 = vrot.lane.b32.xlu0 %v6240_v54, %s5449_s8 }
 0x5cf   :  { %4494 = vrot.lane.b32.xlu1 %v6248_v4, %s5450_s9  ;;  %4492 = vrot.lane.b32.xlu0 %v6242_v12, %s5450_s9 }
 0x5d3   :  { %4496 = vrot.lane.b32.xlu1 %v6250_v33, %s5450_s9  ;;  %4490 = vrot.lane.b32.xlu0 %v6240_v54, %s5450_s9 }
 0x5d7   :  { %4668 = vrot.lane.b32.xlu1 %v6248_v4, %s5451_s10  ;;  %4666 = vrot.lane.b32.xlu0 %v6242_v12, %s5451_s10 }
 0x5db   :  { %4670 = vrot.lane.b32.xlu1 %v6250_v33, %s5451_s10  ;;  %4664 = vrot.lane.b32.xlu0 %v6240_v54, %s5451_s10 }
 0x5df   :  { %4842 = vrot.lane.b32.xlu1 %v6248_v4, %s5452_s11  ;;  %4840 = vrot.lane.b32.xlu0 %v6242_v12, %s5452_s11 }
 0x5e3   :  { %4844 = vrot.lane.b32.xlu1 %v6250_v33, %s5452_s11  ;;  %4838 = vrot.lane.b32.xlu0 %v6240_v54, %s5452_s11 }
 0x619   :  { %v3489_v55 = vpop.permute.xlu1 %3488  ;;  %v3487_v42 = vpop.permute.xlu0 %3486 }
 0x61a   :  { %v3496_v62 = vsel %vm109_vm0, %v3487_v42, %v3489_v55 }
 0x61b   :  { %v3499_v10 = vmul.f32 %v3496_v62, %v5590_v15 }
 0x61d   :  { %v3491_v22 = vpop.permute.xlu1 %3490  ;;  %5214 = vmatprep.subr.msk.mxu0 %vm145_vm1, %v3499_v10  ;;  %v3493_v59 = vpop.permute.xlu0 %3492 }
 0x61e   :  { %v3495_v60 = vsel %vm109_vm0, %v3489_v55, %v3491_v22  ;;  %v3494_v26 = vsel %vm109_vm0, %v3491_v22, %v3493_v59  ;;  %v3497_v58 = vsel %vm109_vm0, %v3493_v59, %v3487_v42 }
 0x61f   :  { %v3500_v53 = vmul.f32 %v3495_v60, %v5601_v20  ;;  %v3498_v40 = vmul.f32 %v3497_v58, %v5593_v16  ;;  %v3501_v37 = vmul.f32 %v3494_v26, %v5598_v19  ;;  %v5388_v58 = vld [vmem:[%s6532_s1 + $0x8] sm:$0xf] }
 0x621   :  { %v3473_v15 = vpop.permute.xlu1 %3472  ;;  %5215 = vmatpush1.msk.msra.mxu0 %vm145_vm1, %v3498_v40  ;;  %5217 = vmatprep.subr.msk.mxu1 %vm145_vm1, %v3501_v37  ;;  %v3471_v13 = vpop.permute.xlu0 %3470 }
 0x622   :  { %v3480_v5 = vsel %vm70_vm3, %v3471_v13, %v3473_v15  ;;  %5216 = vmatmul.mubr.msk.f32.vlgmr.msra.gmra.mrb[4].mxu0 %vm141_vm2, %v5386_v29  ;;  %5218 = vmatpush1.msk.msra.mxu1 %vm145_vm1, %v3500_v53 }
 0x623   :  { %v3483_v16 = vmul.f32 %v3480_v5, %v5623_v31  ;;  %5219 = vmatmul.mubr.msk.f32.vlgmr.msra.gmra.mrb[4].mxu1 %vm141_vm2, %v5386_v29  ;;  %3732 = vmatprep.mubr.f32.mxu0 %v6542_v45 }
 0x624   :  { %3803 = vmatprep.mubr.f32.mxu1 %v6542_v45 }
 0x625   :  { %v3475_v19 = vpop.permute.xlu1 %3474  ;;  %5220 = vmatprep.subr.msk.mxu0 %vm145_vm1, %v3483_v16  ;;  %v3477_v20 = vpop.permute.xlu0 %3476 }
 0x626   :  { %v3479_v17 = vsel %vm70_vm3, %v3473_v15, %v3475_v19  ;;  %v3478_v28 = vsel %vm70_vm3, %v3475_v19, %v3477_v20  ;;  %v3481_v0 = vsel %vm70_vm3, %v3477_v20, %v3471_v13  ;;  %v5389_v19 = vld [vmem:[%s6532_s1 + $0xc] sm:$0xf] }
 0x627   :  { %v3484_v31 = vmul.f32 %v3479_v17, %v5641_v38  ;;  %v3482_v46 = vmul.f32 %v3481_v0, %v5631_v34  ;;  %v3485_v30 = vmul.f32 %v3478_v28, %v5644_v39 }
 0x629   :  { %v3813_v1 = vpop.permute.xlu1 %3812  ;;  %5221 = vmatpush1.msk.msra.mxu0 %vm145_vm1, %v3482_v46  ;;  %5223 = vmatprep.subr.msk.mxu1 %vm145_vm1, %v3485_v30  ;;  %v3811_v35 = vpop.permute.xlu0 %3810 }
 0x62a   :  { %v3820_v3 = vsel %vm465_vm4, %v3811_v35, %v3813_v1  ;;  %5222 = vmatmul.mubr.msk.f32.vlgmr.msra.gmra.mrb[4].mxu0 %vm141_vm2, %v5387_v61  ;;  %5224 = vmatpush1.msk.msra.mxu1 %vm145_vm1, %v3484_v31  ;;  %v5390_v31 = vld [vmem:[%s6532_s1 + $0x10] sm:$0xf] }
 0x62b   :  { %v3823_v34 = vmul.f32 %v3820_v3, %v5668_v50  ;;  %5225 = vmatmul.mubr.msk.f32.vlgmr.msra.gmra.mrb[4].mxu1 %vm141_vm2, %v5387_v61  ;;  %3902 = vmatprep.mubr.f32.mxu0 %v6542_v45 }
 0x62c   :  { %3973 = vmatprep.mubr.f32.mxu1 %v6542_v45 }
 0x62d   :  { %v3815_v38 = vpop.permute.xlu1 %3814  ;;  %5226 = vmatprep.subr.msk.mxu0 %vm145_vm1, %v3823_v34  ;;  %v3817_v39 = vpop.permute.xlu0 %3816 }
 0x62e   :  { %v3819_v55 = vsel %vm465_vm4, %v3813_v1, %v3815_v38  ;;  %v3818_v42 = vsel %vm465_vm4, %v3815_v38, %v3817_v39  ;;  %v3821_v62 = vsel %vm465_vm4, %v3817_v39, %v3811_v35  ;;  %v5391_v39 = vld [vmem:[%s6532_s1 + $0x14] sm:$0xf] }
 0x62f   :  { %v3824_v50 = vmul.f32 %v3819_v55, %v5684_v56  ;;  %v3822_v10 = vmul.f32 %v3821_v62, %v5674_v52  ;;  %v3825_v22 = vmul.f32 %v3818_v42, %v5687_v57 }
 0x631   :  { %v3987_v59 = vpop.permute.xlu1 %3986  ;;  %5227 = vmatpush1.msk.msra.mxu0 %vm145_vm1, %v3822_v10  ;;  %5229 = vmatprep.subr.msk.mxu1 %vm145_vm1, %v3825_v22  ;;  %v3985_v60 = vpop.permute.xlu0 %3984 }
 0x632   :  { %v3994_v26 = vsel %vm666_vm5, %v3985_v60, %v3987_v59  ;;  %5228 = vmatmul.mubr.msk.f32.vlgmr.msra.gmra.mrb[4].mxu0 %vm141_vm2, %v5388_v58  ;;  %5230 = vmatpush1.msk.msra.mxu1 %vm145_vm1, %v3824_v50 }
 0x633   :  { %v3997_v52 = vmul.f32 %v3994_v26, %v5711_v14  ;;  %5231 = vmatmul.mubr.msk.f32.vlgmr.msra.gmra.mrb[4].mxu1 %vm141_vm2, %v5388_v58  ;;  %4076 = vmatprep.mubr.f32.mxu0 %v6542_v45  ;;  %v5392_v26 = vld [vmem:[%s6532_s1 + $0x18] sm:$0xf] }
 0x634   :  { %4147 = vmatprep.mubr.f32.mxu1 %v6542_v45 }
 0x635   :  { %v3989_v56 = vpop.permute.xlu1 %3988  ;;  %5232 = vmatprep.subr.msk.mxu0 %vm145_vm1, %v3997_v52  ;;  %v3991_v57 = vpop.permute.xlu0 %3990 }
 0x636   :  { %v3993_v53 = vsel %vm666_vm5, %v3987_v59, %v3989_v56  ;;  %v3992_v40 = vsel %vm666_vm5, %v3989_v56, %v3991_v57  ;;  %v3995_v37 = vsel %vm666_vm5, %v3991_v57, %v3985_v60 }
 0x637   :  { %v3998_v14 = vmul.f32 %v3993_v53, %v5727_v24  ;;  %v3996_v15 = vmul.f32 %v3995_v37, %v5717_v18  ;;  %v3999_v13 = vmul.f32 %v3992_v40, %v5730_v25  ;;  %v5393_v40 = vld [vmem:[%s6532_s1 + $0x1c] sm:$0xf]  ;;  %s5454_s1 = smov [#allocation5]  }
 0x638   :  { %s5082_s21 = sshll.u32 %s5454_s1, 4  ;;  %s5083_s21 = int_to_ptr.vmem [resolvable:$true] %s5082_s21 }
 0x639   :  { %v4321_v5 = vpop.permute.xlu1 %4320  ;;  %5233 = vmatpush1.msk.msra.mxu0 %vm145_vm1, %v3996_v15  ;;  %5235 = vmatprep.subr.msk.mxu1 %vm145_vm1, %v3999_v13  ;;  %v4319_v29 = vpop.permute.xlu0 %4318  ;;  %s5417_s22 = scalar_lea.vmem %s5083_s21, 256  ;;  %p5422_p9 = scmp.lt.s32.totalorder %s5083_s21, %s5083_s21 }
 0x63a   :  { %v4325_v16 = vsel %vm1024_vm6, %v4319_v29, %v4321_v5  ;;  %5234 = vmatmul.mubr.msk.f32.vlgmr.msra.gmra.mrb[4].mxu0 %vm141_vm2, %v5389_v19  ;;  %5236 = vmatpush1.msk.msra.mxu1 %vm145_vm1, %v3998_v14  ;;  %p5418_p8 = scmp.ne.s32.totalorder %s5083_s21, %s5417_s22  ;;  %p5423_p10 = scmp.lt.s32.totalorder %s5417_s22, %s5417_s22 }
 0x63b   :  { %v4329_v18 = vmul.f32 %v4325_v16, %v5754_v41  ;;  %5238 = vmatprep.subr.msk.mxu0 %vm145_vm1, %v6242_v12  ;;  %5237 = vmatmul.mubr.msk.f32.vlgmr.msra.gmra.mrb[4].mxu1 %vm141_vm2, %v5389_v19 }
 0x63c   :  { %5239 = vmatpush1.msk.msra.mxu0 %vm145_vm1, %v6240_v54  ;;  %5241 = vmatprep.subr.msk.mxu1 %vm145_vm1, %v6250_v33  ;;  %p5424_p11 = por %p5423_p10, %p5422_p9 }
 0x63d   :  { %5242 = vmatpush1.msk.msra.mxu1 %vm145_vm1, %v6248_v4  ;;  %v4323_v24 = vpop.permute.xlu1 %4322  ;;  %5244 = vmatprep.subr.msk.mxu0 %vm145_vm1, %v4329_v18  ;;  %v4317_v25 = vpop.permute.xlu0 %4316 }
 0x63e   :  { %v4326_v41 = vsel %vm1024_vm6, %v4317_v25, %v4319_v29  ;;  %v4327_v12 = vsel %vm1024_vm6, %v4323_v24, %v4317_v25  ;;  %4234 = vmatprep.mubr.f32.mxu0 %v6542_v45  ;;  %4305 = vmatprep.mubr.f32.mxu1 %v6542_v45  ;;  %v4324_v54 = vsel %vm1024_vm6, %v4321_v5, %v4323_v24  ;;  %p5425_p12 = pnand %p5424_p11, %p5418_p8 }
 0x63f   :  { %v4328_v33 = vmul.f32 %v4326_v41, %v5765_v44  ;;  %v4331_v4 = vmul.f32 %v4327_v12, %v5774_v47  ;;  %v4330_v28 = vmul.f32 %v4324_v54, %v5779_v49 }
 0x641   :  { %v4495_v20 = vpop.permute.xlu1 %4494  ;;  %5247 = vmatprep.subr.msk.mxu1 %vm145_vm1, %v4331_v4  ;;  %v4493_v17 = vpop.permute.xlu0 %4492 }
 0x642   :  { %v4499_v0 = vsel %vm1225_vm7, %v4493_v17, %v4495_v20  ;;  %5240 = vmatmul.mubr.msk.f32.vlgmr.msra.gmra.mrb[4].mxu0 %vm141_vm2, %v5390_v31 }
 0x643   :  { %v4503_v46 = vmul.f32 %v4499_v0, %v5803_v2  ;;  %5245 = vmatpush1.msk.msra.mxu0 %vm145_vm1, %v4328_v33  ;;  %5243 = vmatmul.mubr.msk.f32.vlgmr.msra.gmra.mrb[4].mxu1 %vm141_vm2, %v5390_v31 }
 0x644   :  { %5248 = vmatpush1.msk.msra.mxu1 %vm145_vm1, %v4330_v28  ;;  %4408 = vmatprep.mubr.f32.mxu0 %v6542_v45 }
 0x645   :  { %v4497_v44 = vpop.permute.xlu1 %4496  ;;  %5250 = vmatprep.subr.msk.mxu0 %vm145_vm1, %v4503_v46  ;;  %v4491_v47 = vpop.permute.xlu0 %4490  ;;  %4479 = vmatprep.mubr.f32.mxu1 %v6542_v45 }
 0x646   :  { %v4500_v49 = vsel %vm1225_vm7, %v4491_v47, %v4493_v17  ;;  %v4501_v2 = vsel %vm1225_vm7, %v4497_v44, %v4491_v47  ;;  %v4498_v30 = vsel %vm1225_vm7, %v4495_v20, %v4497_v44 }
 0x647   :  { %v4502_v1 = vmul.f32 %v4500_v49, %v5813_v63  ;;  %v4505_v35 = vmul.f32 %v4501_v2, %v5820_v11  ;;  %v4504_v34 = vmul.f32 %v4498_v30, %v5826_v21 }
 0x649   :  { %v4669_v3 = vpop.permute.xlu1 %4668  ;;  %5253 = vmatprep.subr.msk.mxu1 %vm145_vm1, %v4505_v35  ;;  %v4667_v61 = vpop.permute.xlu0 %4666 }
 0x64a   :  { %v4673_v38 = vsel %vm1426_vm8, %v4667_v61, %v4669_v3  ;;  %5246 = vmatmul.mubr.msk.f32.vlgmr.msra.gmra.mrb[4].mxu0 %vm141_vm2, %v5391_v39 }
 0x64b   :  { %v4677_v55 = vmul.f32 %v4673_v38, %v5846_v36  ;;  %5251 = vmatpush1.msk.msra.mxu0 %vm145_vm1, %v4502_v1  ;;  %5249 = vmatmul.mubr.msk.f32.vlgmr.msra.gmra.mrb[4].mxu1 %vm141_vm2, %v5391_v39 }
 0x64c   :  { %5254 = vmatpush1.msk.msra.mxu1 %vm145_vm1, %v4504_v34  ;;  %4582 = vmatprep.mubr.f32.mxu0 %v6542_v45 }
 0x64d   :  { %v4671_v63 = vpop.permute.xlu1 %4670  ;;  %5256 = vmatprep.subr.msk.mxu0 %vm145_vm1, %v4677_v55  ;;  %v4665_v11 = vpop.permute.xlu0 %4664  ;;  %4653 = vmatprep.mubr.f32.mxu1 %v6542_v45 }
 0x64e   :  { %v4674_v21 = vsel %vm1426_vm8, %v4665_v11, %v4667_v61  ;;  %v4675_v36 = vsel %vm1426_vm8, %v4671_v63, %v4665_v11  ;;  %v4672_v42 = vsel %vm1426_vm8, %v4669_v3, %v4671_v63 }
 0x64f   :  { %v4676_v62 = vmul.f32 %v4674_v21, %v5856_v43  ;;  %v4679_v50 = vmul.f32 %v4675_v36, %v5863_v48  ;;  %v4678_v59 = vmul.f32 %v4672_v42, %v5869_v51 }
 0x651   :  { %v4843_v10 = vpop.permute.xlu1 %4842  ;;  %5259 = vmatprep.subr.msk.mxu1 %vm145_vm1, %v4679_v50  ;;  %v4841_v22 = vpop.permute.xlu0 %4840 }
 0x652   :  { %v4847_v60 = vsel %vm1627_vm9, %v4841_v22, %v4843_v10  ;;  %5252 = vmatmul.mubr.msk.f32.vlgmr.msra.gmra.mrb[4].mxu0 %vm141_vm2, %v5392_v26 }
 0x653   :  { %v4851_v58 = vmul.f32 %v4847_v60, %v5889_v6  ;;  %5257 = vmatpush1.msk.msra.mxu0 %vm145_vm1, %v4676_v62  ;;  %5255 = vmatmul.mubr.msk.f32.vlgmr.msra.gmra.mrb[4].mxu1 %vm141_vm2, %v5392_v26 }
 0x654   :  { %5260 = vmatpush1.msk.msra.mxu1 %vm145_vm1, %v4678_v59  ;;  %4756 = vmatprep.mubr.f32.mxu0 %v6542_v45 }
 0x655   :  { %v4845_v43 = vpop.permute.xlu1 %4844  ;;  %5262 = vmatprep.subr.msk.mxu0 %vm145_vm1, %v4851_v58  ;;  %v4839_v48 = vpop.permute.xlu0 %4838  ;;  %4827 = vmatprep.mubr.f32.mxu1 %v6542_v45 }
 0x656   :  { %v4848_v51 = vsel %vm1627_vm9, %v4839_v48, %v4841_v22  ;;  %v4849_v6 = vsel %vm1627_vm9, %v4845_v43, %v4839_v48  ;;  %v4846_v52 = vsel %vm1627_vm9, %v4843_v10, %v4845_v43 }
 0x657   :  { %v4850_v56 = vmul.f32 %v4848_v51, %v5899_v23  ;;  %v4853_v57 = vmul.f32 %v4849_v6, %v5906_v27  ;;  %v4852_v53 = vmul.f32 %v4846_v52, %v5912_v32 }
 0x659   :  { %5265 = vmatprep.subr.msk.mxu1 %vm145_vm1, %v4853_v57 }
 0x65a   :  { %5258 = vmatmul.mubr.msk.f32.vlgmr.msra.gmra.mrb[4].mxu0 %vm141_vm2, %v5393_v40 }
 0x65b   :  { %5263 = vmatpush1.msk.msra.mxu0 %vm145_vm1, %v4850_v56  ;;  %5261 = vmatmul.mubr.msk.f32.vlgmr.msra.gmra.mrb[4].mxu1 %vm141_vm2, %v5393_v40 }
 0x65c   :  { %5266 = vmatpush1.msk.msra.mxu1 %vm145_vm1, %v4852_v53  ;;  %4930 = vmatprep.mubr.f32.mxu0 %v6542_v45 }
 0x65d   :  { %5001 = vmatprep.mubr.f32.mxu1 %v6542_v45 }
 0x662   :  { %5264 = vmatmul.mubr.msk.f32.vlgmr.msra.gmra.mrb[4].mxu0 %vm141_vm2, %v5394_v7 }
 0x663   :  { %5267 = vmatmul.mubr.msk.f32.vlgmr.msra.gmra.mrb[4].mxu1 %vm141_vm2, %v5394_v7 }
 0x735   :  { %v4932_v23 = vpop.f32.mrb[4].mxu0 }
 0x736   :  { %v5012_v27 = vsel %vm145_vm1, %v4932_v23, 0.0  ;;  %v5022_v32 = vmul.f32 %v4932_v23, %v4932_v23  ;;  %v4934_v37 = vpop.f32.mrb[5].mxu0  ;;  %v5003_v14 = vpop.f32.mrb[4].mxu1 }
 0x737   :  { %v5013_v15 = vsel %vm145_vm1, %v4934_v37, 0.0  ;;  %v5023_v13 = vmul.f32 %v4934_v37, %v4934_v37  ;;  %v5024_v5 = vmul.f32 %v5003_v14, %v5003_v14  ;;  %v5005_v29 = vpop.f32.mrb[5].mxu1  ;;  %v5015_v18 = vsel %vm145_vm1, %v5003_v14, 0.0 }
 0x738   :  { %v5026_v45 = vsel %vm145_vm1, %v5022_v32, 0.0  ;;  %v5014_v16 = vadd.f32 %v5013_v15, %v5012_v27  ;;  %v5025_v24 = vmul.f32 %v5005_v29, %v5005_v29  ;;  %v5017_v54 = vsel %vm145_vm1, %v5005_v29, 0.0 }
 0x739   :  { %v5027_v19 = vsel %vm145_vm1, %v5023_v13, 0.0  ;;  %v5029_v12 = vsel %vm145_vm1, %v5024_v5, 0.0 }
 0x73a   :  { %v5028_v25 = vadd.f32 %v5027_v19, %v5026_v45  ;;  %v5016_v41 = vadd.f32 %v5015_v18, %v5014_v16  ;;  %v5031_v20 = vsel %vm145_vm1, %v5025_v24, 0.0 }
 0x73c   :  { %v5018_v33 = vadd.f32 %v5017_v54, %v5016_v41  ;;  %v5030_v4 = vadd.f32 %v5029_v12, %v5028_v25 }
 0x73e   :  { %5019 = vadd.xlane.f32.xlu0 %v5018_v33  ;;  %v5032_v17 = vadd.f32 %v5031_v20, %v5030_v4 }
 0x740   :  { %5033 = vadd.xlane.f32.xlu1 %v5032_v17 }
 0x7cb   :  { %v5020_v28 = vpop.xlane.xlu0 %5019 }
 0x7cc   :  { %v5021_v0 = vmul.f32 0.001953125, %v5020_v28 }
 0x7cd   :  { %v5034_v31 = vpop.xlane.xlu1 %5033 }
 0x7ce   :  { %v5036_v46 = vmul.f32 %v5021_v0, %v5021_v0  ;;  %v5035_v44 = vmul.f32 0.001953125, %v5034_v31 }
 0x7d0   :  { %v5037_v47 = vsub.f32 %v5035_v44, %v5036_v46 }
 0x7d2   :  { %v5038_v49 = vmax.f32 %v5037_v47, 0.0 }
 0x7d4   :  { %v5039_v2 = vadd.f32 1e-05, %v5038_v49 }
 0x7d6   :  { %5384 = vrsqrt.f32 %v5039_v2 }
 0x7e0   :  { %v5385_v30 = vpop.eup %5384 }
 0x7e1   :  { %v5041_v1 = vmul.f32 %v5385_v30, %v5959_v8 }
 0x7e3   :  { %5046 = vperm.xlu0 %5376, %v5041_v1   ;;  %v5042_v35 = vmul.f32 %v5041_v1, %v5021_v0 }
 0x7e5   :  { %v5043_v3 = vsub.f32 %v5965_v9, %v5042_v35 }
 0x7e7   :  { %5055 = vperm.xlu1 %5377, %v5043_v3  }
 0x862   :  { %v5047_v61 = vpop.permute.xlu0 %5046 }
 0x863   :  { %v5049_v34 = vmul.f32 %v5047_v61, %v4932_v23  ;;  %v5050_v38 = vmul.f32 %v5047_v61, %v4934_v37  ;;  %v5051_v39 = vmul.f32 %v5047_v61, %v5003_v14  ;;  %v5052_v55 = vmul.f32 %v5047_v61, %v5005_v29 }
 0x866   :  { %v5056_v63 = vpop.permute.xlu1 %5055 }
 0x867   :  { %v5058_v11 = vadd.f32 %v5056_v63, %v5049_v34  ;;  %v5059_v21 = vadd.f32 %v5056_v63, %v5050_v38  ;;  %v5060_v36 = vadd.f32 %v5056_v63, %v5051_v39  ;;  %v5061_v42 = vadd.f32 %v5056_v63, %v5052_v55 }
 0x869   :  { %v5062_v62 = vmax.f32 %v5058_v11, 0.0  ;;  %v5063_v50 = vmax.f32 %v5059_v21, 0.0  ;;  %v5064_v8 = vmax.f32 %v5060_v36, 0.0  ;;  %v5065_v10 = vmax.f32 %v5061_v42, 0.0 }
 0x86b   :  { %v5070_v22 = vcombine.low %v5062_v62, %v5063_v50  ;;  %v5071_v59 = vcombine.low %v5064_v8, %v5065_v10 }
 0x86d   :  { %5074 = vst [vmem:[#allocation5] sm:$0xff] %v5070_v22  ;;  %5075 = vst [vmem:[#allocation5 + $0x8] sm:$0xff] %v5071_v59 }
 0x86e   :  { %5428 = shalt.err (!%p5425_p12)
}
 0x86f   :  { %s5429_s24 = scalar_lea.hbm %s6536_s5, 256 }
 0x870   :  { %p5430_p13 = scmp.ne.s32.totalorder %s6536_s5, %s5429_s24  ;;  %p5433_p0 = scmp.lt.u32.totalorder %s5429_s24, %s6536_s5 }
 0x872   :  { %p5435_p1 = pnand %p5433_p0, %p5430_p13 }
 0x874   :  { %5438 = shalt.err (!%p5435_p1)
}
 0x875   :  { %5085 = dma.vmem_to_hbm [thread:$0]  %s5083_s21, 256, %s6536_s5, [#allocation4]  }
 0x876   :  { %5441 = dma.done.wait [#allocation4], 256  }
 0x877   :  { %5442 = vsyncadd [#allocation4], 4294967040 }
 0x878   :  { %5089 = vsyncpa [#allocation3], 1 }
 0x879   :  { %5090 = vsyncpa [#allocation4], 1 }

</bundles_post_ra>
